<compile_context>
chip_gen: v6e
topology: v6e:2x2x1
jax: 0.10.0
libtpu: 0.0.40
codegen_flags: <defaults>
</compile_context>

<pallas_src>
import jax
import jax.numpy as jnp
from jax.experimental import pallas as pl
from jax.experimental.pallas import tpu as pltpu

# ----- configuration consistent with the module's constructor (small test sizes) -----
IMG = 16            # image_size
PATCH = 4           # patch_size
IN_CH = 4           # in_channels
EMBED = 32          # embed_dim
DEPTH = 2           # depth
HEADS = 4           # num_heads
MLP_RATIO = 4
NUM_CLASSES = 10
BATCH = 2
N_PATCH = (IMG // PATCH) ** 2        # 16
SEQ = N_PATCH + 1                    # 17 (cls + patches)
S_PAD = 24                           # sequence padded to a multiple of 8 sublanes
PAD_ROWS = S_PAD - SEQ               # 7
HEAD_DIM = EMBED // HEADS            # 8
HIDDEN = MLP_RATIO * EMBED           # 128
PATCH_DIM = IN_CH * PATCH * PATCH    # 64
NC_PAD = 128                         # logits padded to a full lane for an unmasked store
LN_EPS = 1e-5                        # PyTorch LayerNorm default

# rows of the per-layer (8, 128) bias / LayerNorm-param slab
_ROW_IN_B, _ROW_OUT_B, _ROW_LN1_G, _ROW_LN1_B = 0, 1, 2, 3
_ROW_FF1_B, _ROW_FF2_B, _ROW_LN2_G, _ROW_LN2_B = 4, 5, 6, 7
# rows of the (S_PAD, E) misc slab (rows 0..SEQ-1 hold pos embedding)
_ROW_CLS, _ROW_PATCH_B, _ROW_HLN_G, _ROW_HLN_B = 17, 18, 19, 20


# ---------------------------- in-kernel helpers ----------------------------

def _layernorm(x, g, b, eps=LN_EPS):
    # var = E[x^2] - mu^2 so the two cross-lane (XLU) reductions are independent.
    mu = jnp.mean(x, axis=-1, keepdims=True)
    ms = jnp.mean(x * x, axis=-1, keepdims=True)
    var = ms - mu * mu
    return (x - mu) * jax.lax.rsqrt(var + eps) * g + b


def _gelu(x):
    # Exact erf GELU (PyTorch F.gelu default); erf goes to the EUP slot.
    return 0.5 * x * (1.0 + jax.lax.erf(x * 0.7071067811865476))


# ---------------------------- fused forward kernel ----------------------------

def _vit_kernel(patches_ref, misc_ref, patch_w_ref, w_ref, ff2_ref, vec_ref,
                head_w_ref, head_b_ref, out_ref):
    f32 = jnp.float32
    bf16 = jnp.bfloat16
    scale = 1.0 / (HEAD_DIM ** 0.5)

    misc = misc_ref[...]                                                  # (S_PAD, E) f32
    pos0 = misc[0:1, :]
    pos_rest = misc[1:SEQ, :]
    cls = misc[_ROW_CLS:_ROW_CLS + 1, :]
    patch_b = misc[_ROW_PATCH_B:_ROW_PATCH_B + 1, :]
    head_g = misc[_ROW_HLN_G:_ROW_HLN_G + 1, :]
    head_bln = misc[_ROW_HLN_B:_ROW_HLN_B + 1, :]

    # ---- patch embedding: strided Conv2d == per-patch matmul (bf16 MXU, f32 acc) ----
    emb = jnp.einsum("bpd,de->bpe", patches_ref[...].astype(bf16), patch_w_ref[...],
                     preferred_element_type=f32)                          # (B, NP, E)

    # ---- token assembly as a VALUE: [cls | patches] + pos, zero pad to S_PAD rows ----
    h0 = jnp.concatenate([
        jnp.broadcast_to((cls + pos0)[None], (BATCH, 1, EMBED)),
        emb + patch_b + pos_rest[None],
        jnp.zeros((BATCH, PAD_ROWS, EMBED), f32),
    ], axis=1)                                                            # (B, S_PAD, E)

    # additive key-mask for the padded positions (hoisted out of the layer loop)
    key_idx = jax.lax.broadcasted_iota(jnp.int32, (1, 1, S_PAD), 2)
    key_bias = jnp.where(key_idx >= SEQ, f32(-1e30), f32(0.0))            # (1, 1, S_PAD)

    def layer_body(l, h):
        wl = w_ref[l]                                  # (E, 3E+E+HIDDEN) bf16
        in_w = wl[:, 0:3 * EMBED]
        out_w = wl[:, 3 * EMBED:4 * EMBED]
        ff1_w = wl[:, 4 * EMBED:4 * EMBED + HIDDEN]
        ff2_w = ff2_ref[l]                             # (HIDDEN, E) bf16
        vl = vec_ref[l]                                # (8, 128) f32
        in_b = vl[_ROW_IN_B:_ROW_IN_B + 1, 0:3 * EMBED]
        out_b = vl[_ROW_OUT_B:_ROW_OUT_B + 1, 0:EMBED]
        ln1_g = vl[_ROW_LN1_G:_ROW_LN1_G + 1, 0:EMBED]
        ln1_b = vl[_ROW_LN1_B:_ROW_LN1_B + 1, 0:EMBED]
        ff1_b = vl[_ROW_FF1_B:_ROW_FF1_B + 1, 0:HIDDEN]
        ff2_b = vl[_ROW_FF2_B:_ROW_FF2_B + 1, 0:EMBED]
        ln2_g = vl[_ROW_LN2_G:_ROW_LN2_G + 1, 0:EMBED]
        ln2_b = vl[_ROW_LN2_B:_ROW_LN2_B + 1, 0:EMBED]

        # --- multi-head self attention (packed in_proj like PyTorch MHA) ---
        qkv = jnp.einsum("bse,ef->bsf", h.astype(bf16), in_w,
                         preferred_element_type=f32) + in_b               # (B, S_PAD, 3E)
        heads = []
        for hd in range(HEADS):  # static lane slices per head; batched over B
            q = qkv[:, :, hd * HEAD_DIM:(hd + 1) * HEAD_DIM].astype(bf16)
            k = qkv[:, :, EMBED + hd * HEAD_DIM:EMBED + (hd + 1) * HEAD_DIM].astype(bf16)
            v = qkv[:, :, 2 * EMBED + hd * HEAD_DIM:2 * EMBED + (hd + 1) * HEAD_DIM].astype(bf16)
            s = jnp.einsum("bqd,bkd->bqk", q, k,
                           preferred_element_type=f32) * scale            # (B, S_PAD, S_PAD)
            s = s + key_bias                                              # mask padded keys
            m = jnp.max(s, axis=-1, keepdims=True)
            p = jnp.exp(s - m)
            p = p / jnp.sum(p, axis=-1, keepdims=True)                    # exact divide
            heads.append(jnp.einsum("bqk,bkd->bqd", p.astype(bf16), v,
                                    preferred_element_type=f32))          # (B, S_PAD, Dh)
        attn = jnp.concatenate(heads, axis=-1)                            # (B, S_PAD, E)
        sa = jnp.einsum("bse,ef->bsf", attn.astype(bf16), out_w,
                        preferred_element_type=f32) + out_b
        h1 = _layernorm(sa + h, ln1_g, ln1_b)                             # norm1(x + sa)

        # --- feed forward (exact GELU fused in-kernel) ---
        ff = jnp.einsum("bse,eh->bsh", h1.astype(bf16), ff1_w,
                        preferred_element_type=f32) + ff1_b
        ff = _gelu(ff)
        ff = jnp.einsum("bsh,he->bse", ff.astype(bf16), ff2_w,
                        preferred_element_type=f32) + ff2_b
        return _layernorm(ff + h1, ln2_g, ln2_b)                          # norm2(x + ff)

    h = jax.lax.fori_loop(0, DEPTH, layer_body, h0)

    # ---- classification head: one LN + one matmul + one lane-dense store ----
    cls_tok = h[:, 0, :]                                                  # (B, E)
    y = _layernorm(cls_tok, head_g, head_bln)
    logits = jnp.dot(y.astype(bf16), head_w_ref[...],
                     preferred_element_type=f32) + head_b_ref[...]        # (B, NC_PAD)
    out_ref[...] = logits.astype(out_ref.dtype)


# ---------------------------- host-side packing & wrapper ----------------------------

def _pack_params(p):
    """Pack the 20 parameter tensors into a few lane-dense slabs (fewer input DMAs)."""
    # per-layer matmul weights: [in_w | out_w | ff1_w] along lanes, bf16 MXU operands
    w_slab = jnp.concatenate([p["in_w"], p["out_w"], p["ff1_w"]],
                             axis=-1).astype(jnp.bfloat16)                # (D, E, 256)
    ff2_w = p["ff2_w"].astype(jnp.bfloat16)                               # (D, HIDDEN, E)

    def row128(a):  # (D, 1, w) -> (D, 1, 128)
        return jnp.pad(a, ((0, 0), (0, 0), (0, 128 - a.shape[-1])))

    vec_slab = jnp.concatenate([
        row128(p["in_b"]), row128(p["out_b"]), row128(p["ln1_g"]), row128(p["ln1_b"]),
        row128(p["ff1_b"]), row128(p["ff2_b"]), row128(p["ln2_g"]), row128(p["ln2_b"]),
    ], axis=1).astype(jnp.float32)                                        # (D, 8, 128)

    misc = jnp.zeros((S_PAD, EMBED), jnp.float32)
    misc = misc.at[0:SEQ].set(p["pos"])
    misc = misc.at[_ROW_CLS].set(p["cls"][0])
    misc = misc.at[_ROW_PATCH_B].set(p["patch_b"][0])
    misc = misc.at[_ROW_HLN_G].set(p["head_ln_g"][0])
    misc = misc.at[_ROW_HLN_B].set(p["head_ln_b"][0])

    head_w = (jnp.zeros((EMBED, NC_PAD), jnp.float32)
              .at[:, :NUM_CLASSES].set(p["head_w"]).astype(jnp.bfloat16))
    head_b = jnp.zeros((1, NC_PAD), jnp.float32).at[:, :NUM_CLASSES].set(p["head_b"])
    patch_w = p["patch_w"].astype(jnp.bfloat16)
    return misc, patch_w, w_slab, ff2_w, vec_slab, head_w, head_b


def vit_forward(x, params):
    B, C, H, W = x.shape
    nh, nw = H // PATCH, W // PATCH

    # Patch extraction: one XLA relayout BEFORE the single fused kernel.
    # Flatten order (c, ph, pw) matches Conv2d weight (E, C, P, P) flattening.
    patches = x.reshape(B, C, nh, PATCH, nw, PATCH)
    patches = patches.transpose(0, 2, 4, 1, 3, 5).reshape(B, nh * nw, C * PATCH * PATCH)

    inputs = (patches,) + _pack_params(params)
    vmem = pl.BlockSpec(memory_space=pltpu.MemorySpace.VMEM)
    out = pl.pallas_call(
        _vit_kernel,
        out_shape=jax.ShapeDtypeStruct((B, NC_PAD), jnp.float32),
        in_specs=[vmem] * len(inputs),
        out_specs=vmem,
    )(*inputs)
    return out[:, :NUM_CLASSES]


# ---------------------------- deterministic parameter init ----------------------------

def init_params(key):
    keys = iter(jax.random.split(key, 16))

    def nrm(shape, scale=0.02):
        return (scale * jax.random.normal(next(keys), shape)).astype(jnp.float32)

    return {
        # patch embedding (Conv2d weight (E,C,P,P) reshaped/transposed to (C*P*P, E))
        "patch_w": nrm((PATCH_DIM, EMBED)),
        "patch_b": jnp.zeros((1, EMBED), jnp.float32),
        "cls": nrm((1, EMBED)),
        "pos": nrm((SEQ, EMBED)),
        # encoder layers: stacked with leading DEPTH axis, indexed by layer in-kernel
        "in_w": nrm((DEPTH, EMBED, 3 * EMBED)),          # packed q|k|v projection (in_proj^T)
        "in_b": jnp.zeros((DEPTH, 1, 3 * EMBED), jnp.float32),
        "out_w": nrm((DEPTH, EMBED, EMBED)),
        "out_b": jnp.zeros((DEPTH, 1, EMBED), jnp.float32),
        "ln1_g": jnp.ones((DEPTH, 1, EMBED), jnp.float32),
        "ln1_b": jnp.zeros((DEPTH, 1, EMBED), jnp.float32),
        "ff1_w": nrm((DEPTH, EMBED, HIDDEN)),
        "ff1_b": jnp.zeros((DEPTH, 1, HIDDEN), jnp.float32),
        "ff2_w": nrm((DEPTH, HIDDEN, EMBED)),
        "ff2_b": jnp.zeros((DEPTH, 1, EMBED), jnp.float32),
        "ln2_g": jnp.ones((DEPTH, 1, EMBED), jnp.float32),
        "ln2_b": jnp.zeros((DEPTH, 1, EMBED), jnp.float32),
        # head
        "head_ln_g": jnp.ones((1, EMBED), jnp.float32),
        "head_ln_b": jnp.zeros((1, EMBED), jnp.float32),
        "head_w": nrm((EMBED, NUM_CLASSES)),
        "head_b": jnp.zeros((1, NUM_CLASSES), jnp.float32),
    }


if __name__ == "__main__":
    key = jax.random.PRNGKey(0)
    pkey, xkey = jax.random.split(key)
    params = init_params(pkey)
    x = jax.random.normal(xkey, (BATCH, IN_CH, IMG, IMG), dtype=jnp.float32)   # NCHW

    logits = jax.jit(vit_forward)(x, params)
    jax.block_until_ready(logits)
    assert logits.shape == (BATCH, NUM_CLASSES)
    assert bool(jnp.all(jnp.isfinite(logits)))
    print("KERNEL_OK")
</pallas_src>

<mosaic_0001>
module attributes {stable_mosaic.version = 11 : i64} {
  func.func @_vit_kernel(%arg0: memref<2x16x64xf32, #tpu.memory_space<vmem>>, %arg1: memref<24x32xf32, #tpu.memory_space<vmem>>, %arg2: memref<64x32xbf16, #tpu.memory_space<vmem>>, %arg3: memref<2x32x256xbf16, #tpu.memory_space<vmem>>, %arg4: memref<2x128x32xbf16, #tpu.memory_space<vmem>>, %arg5: memref<2x8x128xf32, #tpu.memory_space<vmem>>, %arg6: memref<32x128xbf16, #tpu.memory_space<vmem>>, %arg7: memref<1x128xf32, #tpu.memory_space<vmem>>, %arg8: memref<2x128xf32, #tpu.memory_space<vmem>>) attributes {dimension_semantics = [], scalar_prefetch = 0 : i64, scratch_operands = 0 : i64, tpu.core_type = #tpu.core_type<tc>} {
    %c0 = arith.constant 0 : index
    %c0_0 = arith.constant 0 : index
    %0 = vector.load %arg1[%c0, %c0_0] : memref<24x32xf32, #tpu.memory_space<vmem>>, vector<24x32xf32>
    %1 = vector.extract_strided_slice %0 {offsets = [0, 0], sizes = [1, 32], strides = [1, 1]} : vector<24x32xf32> to vector<1x32xf32>
    %2 = vector.extract_strided_slice %0 {offsets = [1, 0], sizes = [16, 32], strides = [1, 1]} : vector<24x32xf32> to vector<16x32xf32>
    %3 = vector.extract_strided_slice %0 {offsets = [17, 0], sizes = [1, 32], strides = [1, 1]} : vector<24x32xf32> to vector<1x32xf32>
    %4 = vector.extract_strided_slice %0 {offsets = [18, 0], sizes = [1, 32], strides = [1, 1]} : vector<24x32xf32> to vector<1x32xf32>
    %5 = vector.extract_strided_slice %0 {offsets = [19, 0], sizes = [1, 32], strides = [1, 1]} : vector<24x32xf32> to vector<1x32xf32>
    %6 = vector.extract_strided_slice %0 {offsets = [20, 0], sizes = [1, 32], strides = [1, 1]} : vector<24x32xf32> to vector<1x32xf32>
    %c0_1 = arith.constant 0 : index
    %c0_2 = arith.constant 0 : index
    %c0_3 = arith.constant 0 : index
    %7 = vector.load %arg0[%c0_1, %c0_2, %c0_3] : memref<2x16x64xf32, #tpu.memory_space<vmem>>, vector<2x16x64xf32>
    %8 = arith.truncf %7 : vector<2x16x64xf32> to vector<2x16x64xbf16>
    %c0_4 = arith.constant 0 : index
    %c0_5 = arith.constant 0 : index
    %9 = vector.load %arg2[%c0_4, %c0_5] : memref<64x32xbf16, #tpu.memory_space<vmem>>, vector<64x32xbf16>
    "tpu.trace_start"() <{level = 10 : i32, message = "bpd,de->bpe"}> : () -> ()
    %cst = arith.constant dense<0.000000e+00> : vector<2x16x32xf32>
    %10 = tpu.matmul %8, %9, %cst {dimension_numbers = #tpu.dot_dimension_numbers<[2], [0], [0, 1], [1], [0, 0, 0, 1, 1, 1], [], []>} : vector<2x16x64xbf16>, vector<64x32xbf16>, vector<2x16x32xf32> -> vector<2x16x32xf32>
    "tpu.trace_stop"() : () -> ()
    %11 = arith.addf %3, %1 : vector<1x32xf32>
    %12 = vector.shape_cast %11 : vector<1x32xf32> to vector<1x1x32xf32>
    %13 = vector.shape_cast %12 : vector<1x1x32xf32> to vector<1x1x32xf32>
    %14 = vector.broadcast %13 : vector<1x1x32xf32> to vector<2x1x32xf32>
    %15 = vector.shape_cast %4 : vector<1x32xf32> to vector<1x1x32xf32>
    %16 = vector.broadcast %15 : vector<1x1x32xf32> to vector<2x16x32xf32>
    %17 = arith.addf %10, %16 : vector<2x16x32xf32>
    %18 = vector.shape_cast %2 : vector<16x32xf32> to vector<1x16x32xf32>
    %19 = vector.broadcast %18 : vector<1x16x32xf32> to vector<2x16x32xf32>
    %20 = arith.addf %17, %19 : vector<2x16x32xf32>
    %cst_6 = arith.constant 0.000000e+00 : f32
    %21 = vector.broadcast %cst_6 : f32 to vector<2x7x32xf32>
    %22 = tpu.concatenate %14, %20, %21 in 1 : vector<2x1x32xf32>, vector<2x16x32xf32>, vector<2x7x32xf32> -> vector<2x24x32xf32>
    %23 = tpu.iota {dimensions = array<i32: 2>} : vector<1x1x24xi32>
    %c17_i32 = arith.constant 17 : i32
    %24 = vector.broadcast %c17_i32 : i32 to vector<1x1x24xi32>
    %25 = arith.cmpi sge, %23, %24 : vector<1x1x24xi32>
    %cst_7 = arith.constant -1.000000e+30 : f32
    %cst_8 = arith.constant 0.000000e+00 : f32
    %26 = vector.broadcast %cst_7 : f32 to vector<1x1x24xf32>
    %27 = vector.broadcast %cst_8 : f32 to vector<1x1x24xf32>
    %28 = arith.select %25, %26, %27 : vector<1x1x24xi1>, vector<1x1x24xf32>
    %c0_i32 = arith.constant 0 : i32
    %c2_i32 = arith.constant 2 : i32
    %29 = arith.addi %c0_i32, %c2_i32 : i32
    %c1_i32 = arith.constant 1 : i32
    %30 = scf.for %arg9 = %c0_i32 to %29 step %c1_i32 iter_args(%arg10 = %22) -> (vector<2x24x32xf32>)  : i32 {
      %62 = arith.index_cast %arg9 : i32 to index
      %c0_22 = arith.constant 0 : index
      %c0_23 = arith.constant 0 : index
      %63 = vector.load %arg3[%62, %c0_22, %c0_23] : memref<2x32x256xbf16, #tpu.memory_space<vmem>>, vector<1x32x256xbf16>
      %64 = vector.shape_cast %63 : vector<1x32x256xbf16> to vector<32x256xbf16>
      %65 = vector.extract_strided_slice %64 {offsets = [0, 0], sizes = [32, 96], strides = [1, 1]} : vector<32x256xbf16> to vector<32x96xbf16>
      %66 = vector.extract_strided_slice %64 {offsets = [0, 96], sizes = [32, 32], strides = [1, 1]} : vector<32x256xbf16> to vector<32x32xbf16>
      %67 = vector.extract_strided_slice %64 {offsets = [0, 128], sizes = [32, 128], strides = [1, 1]} : vector<32x256xbf16> to vector<32x128xbf16>
      %68 = arith.index_cast %arg9 : i32 to index
      %c0_24 = arith.constant 0 : index
      %c0_25 = arith.constant 0 : index
      %69 = vector.load %arg4[%68, %c0_24, %c0_25] : memref<2x128x32xbf16, #tpu.memory_space<vmem>>, vector<1x128x32xbf16>
      %70 = vector.shape_cast %69 : vector<1x128x32xbf16> to vector<128x32xbf16>
      %71 = arith.index_cast %arg9 : i32 to index
      %c0_26 = arith.constant 0 : index
      %c0_27 = arith.constant 0 : index
      %72 = vector.load %arg5[%71, %c0_26, %c0_27] : memref<2x8x128xf32, #tpu.memory_space<vmem>>, vector<1x8x128xf32>
      %73 = vector.shape_cast %72 : vector<1x8x128xf32> to vector<8x128xf32>
      %74 = vector.extract_strided_slice %73 {offsets = [0, 0], sizes = [1, 96], strides = [1, 1]} : vector<8x128xf32> to vector<1x96xf32>
      %75 = vector.extract_strided_slice %73 {offsets = [1, 0], sizes = [1, 32], strides = [1, 1]} : vector<8x128xf32> to vector<1x32xf32>
      %76 = vector.extract_strided_slice %73 {offsets = [2, 0], sizes = [1, 32], strides = [1, 1]} : vector<8x128xf32> to vector<1x32xf32>
      %77 = vector.extract_strided_slice %73 {offsets = [3, 0], sizes = [1, 32], strides = [1, 1]} : vector<8x128xf32> to vector<1x32xf32>
      %78 = vector.extract_strided_slice %73 {offsets = [4, 0], sizes = [1, 128], strides = [1, 1]} : vector<8x128xf32> to vector<1x128xf32>
      %79 = vector.extract_strided_slice %73 {offsets = [5, 0], sizes = [1, 32], strides = [1, 1]} : vector<8x128xf32> to vector<1x32xf32>
      %80 = vector.extract_strided_slice %73 {offsets = [6, 0], sizes = [1, 32], strides = [1, 1]} : vector<8x128xf32> to vector<1x32xf32>
      %81 = vector.extract_strided_slice %73 {offsets = [7, 0], sizes = [1, 32], strides = [1, 1]} : vector<8x128xf32> to vector<1x32xf32>
      %82 = arith.truncf %arg10 : vector<2x24x32xf32> to vector<2x24x32xbf16>
      "tpu.trace_start"() <{level = 10 : i32, message = "bse,ef->bsf"}> : () -> ()
      %cst_28 = arith.constant dense<0.000000e+00> : vector<2x24x96xf32>
      %83 = tpu.matmul %82, %65, %cst_28 {dimension_numbers = #tpu.dot_dimension_numbers<[2], [0], [0, 1], [1], [0, 0, 0, 1, 1, 1], [], []>} : vector<2x24x32xbf16>, vector<32x96xbf16>, vector<2x24x96xf32> -> vector<2x24x96xf32>
      "tpu.trace_stop"() : () -> ()
      %84 = vector.shape_cast %74 : vector<1x96xf32> to vector<1x1x96xf32>
      %85 = vector.broadcast %84 : vector<1x1x96xf32> to vector<2x24x96xf32>
      %86 = arith.addf %83, %85 : vector<2x24x96xf32>
      %87 = vector.extract_strided_slice %86 {offsets = [0, 0, 0], sizes = [2, 24, 8], strides = [1, 1, 1]} : vector<2x24x96xf32> to vector<2x24x8xf32>
      %88 = arith.truncf %87 : vector<2x24x8xf32> to vector<2x24x8xbf16>
      %89 = vector.extract_strided_slice %86 {offsets = [0, 0, 32], sizes = [2, 24, 8], strides = [1, 1, 1]} : vector<2x24x96xf32> to vector<2x24x8xf32>
      %90 = arith.truncf %89 : vector<2x24x8xf32> to vector<2x24x8xbf16>
      %91 = vector.extract_strided_slice %86 {offsets = [0, 0, 64], sizes = [2, 24, 8], strides = [1, 1, 1]} : vector<2x24x96xf32> to vector<2x24x8xf32>
      %92 = arith.truncf %91 : vector<2x24x8xf32> to vector<2x24x8xbf16>
      "tpu.trace_start"() <{level = 10 : i32, message = "bqd,bkd->bqk"}> : () -> ()
      %cst_29 = arith.constant dense<0.000000e+00> : vector<2x24x24xf32>
      %93 = tpu.matmul %88, %90, %cst_29 {dimension_numbers = #tpu.dot_dimension_numbers<[2], [2], [1], [1], [0, 0, 0, 1, 1, 1], [0], [0]>} : vector<2x24x8xbf16>, vector<2x24x8xbf16>, vector<2x24x24xf32> -> vector<2x24x24xf32>
      "tpu.trace_stop"() : () -> ()
      %cst_30 = arith.constant 0.353553385 : f32
      %94 = vector.broadcast %cst_30 : f32 to vector<2x24x24xf32>
      %95 = arith.mulf %93, %94 : vector<2x24x24xf32>
      %96 = vector.broadcast %28 : vector<1x1x24xf32> to vector<2x24x24xf32>
      %97 = arith.addf %95, %96 : vector<2x24x24xf32>
      %cst_31 = arith.constant dense<0xFF800000> : vector<2x24xf32>
      %98 = vector.multi_reduction <maximumf>, %97, %cst_31 [2] : vector<2x24x24xf32> to vector<2x24xf32>
      %99 = vector.shape_cast %98 : vector<2x24xf32> to vector<2x24x1xf32>
      %100 = vector.broadcast %99 : vector<2x24x1xf32> to vector<2x24x24xf32>
      %101 = arith.subf %97, %100 : vector<2x24x24xf32>
      %102 = math.exp %101 : vector<2x24x24xf32>
      %cst_32 = arith.constant dense<0.000000e+00> : vector<2x24xf32>
      %103 = vector.multi_reduction <add>, %102, %cst_32 [2] : vector<2x24x24xf32> to vector<2x24xf32>
      %104 = vector.shape_cast %103 : vector<2x24xf32> to vector<2x24x1xf32>
      %105 = vector.broadcast %104 : vector<2x24x1xf32> to vector<2x24x24xf32>
      %106 = arith.divf %102, %105 : vector<2x24x24xf32>
      %107 = arith.truncf %106 : vector<2x24x24xf32> to vector<2x24x24xbf16>
      "tpu.trace_start"() <{level = 10 : i32, message = "bqk,bkd->bqd"}> : () -> ()
      %cst_33 = arith.constant dense<0.000000e+00> : vector<2x24x8xf32>
      %108 = tpu.matmul %107, %92, %cst_33 {dimension_numbers = #tpu.dot_dimension_numbers<[2], [1], [1], [2], [0, 0, 0, 1, 1, 2], [0], [0]>} : vector<2x24x24xbf16>, vector<2x24x8xbf16>, vector<2x24x8xf32> -> vector<2x24x8xf32>
      "tpu.trace_stop"() : () -> ()
      %109 = vector.extract_strided_slice %86 {offsets = [0, 0, 8], sizes = [2, 24, 8], strides = [1, 1, 1]} : vector<2x24x96xf32> to vector<2x24x8xf32>
      %110 = arith.truncf %109 : vector<2x24x8xf32> to vector<2x24x8xbf16>
      %111 = vector.extract_strided_slice %86 {offsets = [0, 0, 40], sizes = [2, 24, 8], strides = [1, 1, 1]} : vector<2x24x96xf32> to vector<2x24x8xf32>
      %112 = arith.truncf %111 : vector<2x24x8xf32> to vector<2x24x8xbf16>
      %113 = vector.extract_strided_slice %86 {offsets = [0, 0, 72], sizes = [2, 24, 8], strides = [1, 1, 1]} : vector<2x24x96xf32> to vector<2x24x8xf32>
      %114 = arith.truncf %113 : vector<2x24x8xf32> to vector<2x24x8xbf16>
      "tpu.trace_start"() <{level = 10 : i32, message = "bqd,bkd->bqk"}> : () -> ()
      %cst_34 = arith.constant dense<0.000000e+00> : vector<2x24x24xf32>
      %115 = tpu.matmul %110, %112, %cst_34 {dimension_numbers = #tpu.dot_dimension_numbers<[2], [2], [1], [1], [0, 0, 0, 1, 1, 1], [0], [0]>} : vector<2x24x8xbf16>, vector<2x24x8xbf16>, vector<2x24x24xf32> -> vector<2x24x24xf32>
      "tpu.trace_stop"() : () -> ()
      %cst_35 = arith.constant 0.353553385 : f32
      %116 = vector.broadcast %cst_35 : f32 to vector<2x24x24xf32>
      %117 = arith.mulf %115, %116 : vector<2x24x24xf32>
      %118 = vector.broadcast %28 : vector<1x1x24xf32> to vector<2x24x24xf32>
      %119 = arith.addf %117, %118 : vector<2x24x24xf32>
      %cst_36 = arith.constant dense<0xFF800000> : vector<2x24xf32>
      %120 = vector.multi_reduction <maximumf>, %119, %cst_36 [2] : vector<2x24x24xf32> to vector<2x24xf32>
      %121 = vector.shape_cast %120 : vector<2x24xf32> to vector<2x24x1xf32>
      %122 = vector.broadcast %121 : vector<2x24x1xf32> to vector<2x24x24xf32>
      %123 = arith.subf %119, %122 : vector<2x24x24xf32>
      %124 = math.exp %123 : vector<2x24x24xf32>
      %cst_37 = arith.constant dense<0.000000e+00> : vector<2x24xf32>
      %125 = vector.multi_reduction <add>, %124, %cst_37 [2] : vector<2x24x24xf32> to vector<2x24xf32>
      %126 = vector.shape_cast %125 : vector<2x24xf32> to vector<2x24x1xf32>
      %127 = vector.broadcast %126 : vector<2x24x1xf32> to vector<2x24x24xf32>
      %128 = arith.divf %124, %127 : vector<2x24x24xf32>
      %129 = arith.truncf %128 : vector<2x24x24xf32> to vector<2x24x24xbf16>
      "tpu.trace_start"() <{level = 10 : i32, message = "bqk,bkd->bqd"}> : () -> ()
      %cst_38 = arith.constant dense<0.000000e+00> : vector<2x24x8xf32>
      %130 = tpu.matmul %129, %114, %cst_38 {dimension_numbers = #tpu.dot_dimension_numbers<[2], [1], [1], [2], [0, 0, 0, 1, 1, 2], [0], [0]>} : vector<2x24x24xbf16>, vector<2x24x8xbf16>, vector<2x24x8xf32> -> vector<2x24x8xf32>
      "tpu.trace_stop"() : () -> ()
      %131 = vector.extract_strided_slice %86 {offsets = [0, 0, 16], sizes = [2, 24, 8], strides = [1, 1, 1]} : vector<2x24x96xf32> to vector<2x24x8xf32>
      %132 = arith.truncf %131 : vector<2x24x8xf32> to vector<2x24x8xbf16>
      %133 = vector.extract_strided_slice %86 {offsets = [0, 0, 48], sizes = [2, 24, 8], strides = [1, 1, 1]} : vector<2x24x96xf32> to vector<2x24x8xf32>
      %134 = arith.truncf %133 : vector<2x24x8xf32> to vector<2x24x8xbf16>
      %135 = vector.extract_strided_slice %86 {offsets = [0, 0, 80], sizes = [2, 24, 8], strides = [1, 1, 1]} : vector<2x24x96xf32> to vector<2x24x8xf32>
      %136 = arith.truncf %135 : vector<2x24x8xf32> to vector<2x24x8xbf16>
      "tpu.trace_start"() <{level = 10 : i32, message = "bqd,bkd->bqk"}> : () -> ()
      %cst_39 = arith.constant dense<0.000000e+00> : vector<2x24x24xf32>
      %137 = tpu.matmul %132, %134, %cst_39 {dimension_numbers = #tpu.dot_dimension_numbers<[2], [2], [1], [1], [0, 0, 0, 1, 1, 1], [0], [0]>} : vector<2x24x8xbf16>, vector<2x24x8xbf16>, vector<2x24x24xf32> -> vector<2x24x24xf32>
      "tpu.trace_stop"() : () -> ()
      %cst_40 = arith.constant 0.353553385 : f32
      %138 = vector.broadcast %cst_40 : f32 to vector<2x24x24xf32>
      %139 = arith.mulf %137, %138 : vector<2x24x24xf32>
      %140 = vector.broadcast %28 : vector<1x1x24xf32> to vector<2x24x24xf32>
      %141 = arith.addf %139, %140 : vector<2x24x24xf32>
      %cst_41 = arith.constant dense<0xFF800000> : vector<2x24xf32>
      %142 = vector.multi_reduction <maximumf>, %141, %cst_41 [2] : vector<2x24x24xf32> to vector<2x24xf32>
      %143 = vector.shape_cast %142 : vector<2x24xf32> to vector<2x24x1xf32>
      %144 = vector.broadcast %143 : vector<2x24x1xf32> to vector<2x24x24xf32>
      %145 = arith.subf %141, %144 : vector<2x24x24xf32>
      %146 = math.exp %145 : vector<2x24x24xf32>
      %cst_42 = arith.constant dense<0.000000e+00> : vector<2x24xf32>
      %147 = vector.multi_reduction <add>, %146, %cst_42 [2] : vector<2x24x24xf32> to vector<2x24xf32>
      %148 = vector.shape_cast %147 : vector<2x24xf32> to vector<2x24x1xf32>
      %149 = vector.broadcast %148 : vector<2x24x1xf32> to vector<2x24x24xf32>
      %150 = arith.divf %146, %149 : vector<2x24x24xf32>
      %151 = arith.truncf %150 : vector<2x24x24xf32> to vector<2x24x24xbf16>
      "tpu.trace_start"() <{level = 10 : i32, message = "bqk,bkd->bqd"}> : () -> ()
      %cst_43 = arith.constant dense<0.000000e+00> : vector<2x24x8xf32>
      %152 = tpu.matmul %151, %136, %cst_43 {dimension_numbers = #tpu.dot_dimension_numbers<[2], [1], [1], [2], [0, 0, 0, 1, 1, 2], [0], [0]>} : vector<2x24x24xbf16>, vector<2x24x8xbf16>, vector<2x24x8xf32> -> vector<2x24x8xf32>
      "tpu.trace_stop"() : () -> ()
      %153 = vector.extract_strided_slice %86 {offsets = [0, 0, 24], sizes = [2, 24, 8], strides = [1, 1, 1]} : vector<2x24x96xf32> to vector<2x24x8xf32>
      %154 = arith.truncf %153 : vector<2x24x8xf32> to vector<2x24x8xbf16>
      %155 = vector.extract_strided_slice %86 {offsets = [0, 0, 56], sizes = [2, 24, 8], strides = [1, 1, 1]} : vector<2x24x96xf32> to vector<2x24x8xf32>
      %156 = arith.truncf %155 : vector<2x24x8xf32> to vector<2x24x8xbf16>
      %157 = vector.extract_strided_slice %86 {offsets = [0, 0, 88], sizes = [2, 24, 8], strides = [1, 1, 1]} : vector<2x24x96xf32> to vector<2x24x8xf32>
      %158 = arith.truncf %157 : vector<2x24x8xf32> to vector<2x24x8xbf16>
      "tpu.trace_start"() <{level = 10 : i32, message = "bqd,bkd->bqk"}> : () -> ()
      %cst_44 = arith.constant dense<0.000000e+00> : vector<2x24x24xf32>
      %159 = tpu.matmul %154, %156, %cst_44 {dimension_numbers = #tpu.dot_dimension_numbers<[2], [2], [1], [1], [0, 0, 0, 1, 1, 1], [0], [0]>} : vector<2x24x8xbf16>, vector<2x24x8xbf16>, vector<2x24x24xf32> -> vector<2x24x24xf32>
      "tpu.trace_stop"() : () -> ()
      %cst_45 = arith.constant 0.353553385 : f32
      %160 = vector.broadcast %cst_45 : f32 to vector<2x24x24xf32>
      %161 = arith.mulf %159, %160 : vector<2x24x24xf32>
      %162 = vector.broadcast %28 : vector<1x1x24xf32> to vector<2x24x24xf32>
      %163 = arith.addf %161, %162 : vector<2x24x24xf32>
      %cst_46 = arith.constant dense<0xFF800000> : vector<2x24xf32>
      %164 = vector.multi_reduction <maximumf>, %163, %cst_46 [2] : vector<2x24x24xf32> to vector<2x24xf32>
      %165 = vector.shape_cast %164 : vector<2x24xf32> to vector<2x24x1xf32>
      %166 = vector.broadcast %165 : vector<2x24x1xf32> to vector<2x24x24xf32>
      %167 = arith.subf %163, %166 : vector<2x24x24xf32>
      %168 = math.exp %167 : vector<2x24x24xf32>
      %cst_47 = arith.constant dense<0.000000e+00> : vector<2x24xf32>
      %169 = vector.multi_reduction <add>, %168, %cst_47 [2] : vector<2x24x24xf32> to vector<2x24xf32>
      %170 = vector.shape_cast %169 : vector<2x24xf32> to vector<2x24x1xf32>
      %171 = vector.broadcast %170 : vector<2x24x1xf32> to vector<2x24x24xf32>
      %172 = arith.divf %168, %171 : vector<2x24x24xf32>
      %173 = arith.truncf %172 : vector<2x24x24xf32> to vector<2x24x24xbf16>
      "tpu.trace_start"() <{level = 10 : i32, message = "bqk,bkd->bqd"}> : () -> ()
      %cst_48 = arith.constant dense<0.000000e+00> : vector<2x24x8xf32>
      %174 = tpu.matmul %173, %158, %cst_48 {dimension_numbers = #tpu.dot_dimension_numbers<[2], [1], [1], [2], [0, 0, 0, 1, 1, 2], [0], [0]>} : vector<2x24x24xbf16>, vector<2x24x8xbf16>, vector<2x24x8xf32> -> vector<2x24x8xf32>
      "tpu.trace_stop"() : () -> ()
      %175 = tpu.concatenate %108, %130, %152, %174 in 2 : vector<2x24x8xf32>, vector<2x24x8xf32>, vector<2x24x8xf32>, vector<2x24x8xf32> -> vector<2x24x32xf32>
      %176 = arith.truncf %175 : vector<2x24x32xf32> to vector<2x24x32xbf16>
      "tpu.trace_start"() <{level = 10 : i32, message = "bse,ef->bsf"}> : () -> ()
      %cst_49 = arith.constant dense<0.000000e+00> : vector<2x24x32xf32>
      %177 = tpu.matmul %176, %66, %cst_49 {dimension_numbers = #tpu.dot_dimension_numbers<[2], [0], [0, 1], [1], [0, 0, 0, 1, 1, 1], [], []>} : vector<2x24x32xbf16>, vector<32x32xbf16>, vector<2x24x32xf32> -> vector<2x24x32xf32>
      "tpu.trace_stop"() : () -> ()
      %178 = vector.shape_cast %75 : vector<1x32xf32> to vector<1x1x32xf32>
      %179 = vector.broadcast %178 : vector<1x1x32xf32> to vector<2x24x32xf32>
      %180 = arith.addf %177, %179 : vector<2x24x32xf32>
      %181 = arith.addf %180, %arg10 : vector<2x24x32xf32>
      %cst_50 = arith.constant dense<0.000000e+00> : vector<2x24xf32>
      %182 = vector.multi_reduction <add>, %181, %cst_50 [2] : vector<2x24x32xf32> to vector<2x24xf32>
      %183 = vector.shape_cast %182 : vector<2x24xf32> to vector<2x24x1xf32>
      %cst_51 = arith.constant 3.200000e+01 : f32
      %184 = vector.broadcast %cst_51 : f32 to vector<2x24x1xf32>
      %185 = arith.divf %183, %184 : vector<2x24x1xf32>
      %186 = arith.mulf %181, %181 : vector<2x24x32xf32>
      %cst_52 = arith.constant dense<0.000000e+00> : vector<2x24xf32>
      %187 = vector.multi_reduction <add>, %186, %cst_52 [2] : vector<2x24x32xf32> to vector<2x24xf32>
      %188 = vector.shape_cast %187 : vector<2x24xf32> to vector<2x24x1xf32>
      %cst_53 = arith.constant 3.200000e+01 : f32
      %189 = vector.broadcast %cst_53 : f32 to vector<2x24x1xf32>
      %190 = arith.divf %188, %189 : vector<2x24x1xf32>
      %191 = arith.mulf %185, %185 : vector<2x24x1xf32>
      %192 = arith.subf %190, %191 : vector<2x24x1xf32>
      %193 = vector.broadcast %185 : vector<2x24x1xf32> to vector<2x24x32xf32>
      %194 = arith.subf %181, %193 : vector<2x24x32xf32>
      %cst_54 = arith.constant 9.99999974E-6 : f32
      %195 = vector.broadcast %cst_54 : f32 to vector<2x24x1xf32>
      %196 = arith.addf %192, %195 : vector<2x24x1xf32>
      %197 = math.rsqrt %196 : vector<2x24x1xf32>
      %198 = vector.broadcast %197 : vector<2x24x1xf32> to vector<2x24x32xf32>
      %199 = arith.mulf %194, %198 : vector<2x24x32xf32>
      %200 = vector.shape_cast %76 : vector<1x32xf32> to vector<1x1x32xf32>
      %201 = vector.broadcast %200 : vector<1x1x32xf32> to vector<2x24x32xf32>
      %202 = arith.mulf %199, %201 : vector<2x24x32xf32>
      %203 = vector.shape_cast %77 : vector<1x32xf32> to vector<1x1x32xf32>
      %204 = vector.broadcast %203 : vector<1x1x32xf32> to vector<2x24x32xf32>
      %205 = arith.addf %202, %204 : vector<2x24x32xf32>
      %206 = arith.truncf %205 : vector<2x24x32xf32> to vector<2x24x32xbf16>
      "tpu.trace_start"() <{level = 10 : i32, message = "bse,eh->bsh"}> : () -> ()
      %cst_55 = arith.constant dense<0.000000e+00> : vector<2x24x128xf32>
      %207 = tpu.matmul %206, %67, %cst_55 {dimension_numbers = #tpu.dot_dimension_numbers<[2], [0], [0, 1], [1], [0, 0, 0, 1, 1, 1], [], []>} : vector<2x24x32xbf16>, vector<32x128xbf16>, vector<2x24x128xf32> -> vector<2x24x128xf32>
      "tpu.trace_stop"() : () -> ()
      %208 = vector.shape_cast %78 : vector<1x128xf32> to vector<1x1x128xf32>
      %209 = vector.broadcast %208 : vector<1x1x128xf32> to vector<2x24x128xf32>
      %210 = arith.addf %207, %209 : vector<2x24x128xf32>
      %cst_56 = arith.constant 5.000000e-01 : f32
      %211 = vector.broadcast %cst_56 : f32 to vector<2x24x128xf32>
      %212 = arith.mulf %211, %210 : vector<2x24x128xf32>
      %cst_57 = arith.constant 0.707106769 : f32
      %213 = vector.broadcast %cst_57 : f32 to vector<2x24x128xf32>
      %214 = arith.mulf %210, %213 : vector<2x24x128xf32>
      %215 = math.erf %214 : vector<2x24x128xf32>
      %cst_58 = arith.constant 1.000000e+00 : f32
      %216 = vector.broadcast %cst_58 : f32 to vector<2x24x128xf32>
      %217 = arith.addf %216, %215 : vector<2x24x128xf32>
      %218 = arith.mulf %212, %217 : vector<2x24x128xf32>
      %219 = arith.truncf %218 : vector<2x24x128xf32> to vector<2x24x128xbf16>
      "tpu.trace_start"() <{level = 10 : i32, message = "bsh,he->bse"}> : () -> ()
      %cst_59 = arith.constant dense<0.000000e+00> : vector<2x24x32xf32>
      %220 = tpu.matmul %219, %70, %cst_59 {dimension_numbers = #tpu.dot_dimension_numbers<[2], [0], [0, 1], [1], [0, 0, 0, 1, 1, 1], [], []>} : vector<2x24x128xbf16>, vector<128x32xbf16>, vector<2x24x32xf32> -> vector<2x24x32xf32>
      "tpu.trace_stop"() : () -> ()
      %221 = vector.shape_cast %79 : vector<1x32xf32> to vector<1x1x32xf32>
      %222 = vector.broadcast %221 : vector<1x1x32xf32> to vector<2x24x32xf32>
      %223 = arith.addf %220, %222 : vector<2x24x32xf32>
      %224 = arith.addf %223, %205 : vector<2x24x32xf32>
      %cst_60 = arith.constant dense<0.000000e+00> : vector<2x24xf32>
      %225 = vector.multi_reduction <add>, %224, %cst_60 [2] : vector<2x24x32xf32> to vector<2x24xf32>
      %226 = vector.shape_cast %225 : vector<2x24xf32> to vector<2x24x1xf32>
      %cst_61 = arith.constant 3.200000e+01 : f32
      %227 = vector.broadcast %cst_61 : f32 to vector<2x24x1xf32>
      %228 = arith.divf %226, %227 : vector<2x24x1xf32>
      %229 = arith.mulf %224, %224 : vector<2x24x32xf32>
      %cst_62 = arith.constant dense<0.000000e+00> : vector<2x24xf32>
      %230 = vector.multi_reduction <add>, %229, %cst_62 [2] : vector<2x24x32xf32> to vector<2x24xf32>
      %231 = vector.shape_cast %230 : vector<2x24xf32> to vector<2x24x1xf32>
      %cst_63 = arith.constant 3.200000e+01 : f32
      %232 = vector.broadcast %cst_63 : f32 to vector<2x24x1xf32>
      %233 = arith.divf %231, %232 : vector<2x24x1xf32>
      %234 = arith.mulf %228, %228 : vector<2x24x1xf32>
      %235 = arith.subf %233, %234 : vector<2x24x1xf32>
      %236 = vector.broadcast %228 : vector<2x24x1xf32> to vector<2x24x32xf32>
      %237 = arith.subf %224, %236 : vector<2x24x32xf32>
      %cst_64 = arith.constant 9.99999974E-6 : f32
      %238 = vector.broadcast %cst_64 : f32 to vector<2x24x1xf32>
      %239 = arith.addf %235, %238 : vector<2x24x1xf32>
      %240 = math.rsqrt %239 : vector<2x24x1xf32>
      %241 = vector.broadcast %240 : vector<2x24x1xf32> to vector<2x24x32xf32>
      %242 = arith.mulf %237, %241 : vector<2x24x32xf32>
      %243 = vector.shape_cast %80 : vector<1x32xf32> to vector<1x1x32xf32>
      %244 = vector.broadcast %243 : vector<1x1x32xf32> to vector<2x24x32xf32>
      %245 = arith.mulf %242, %244 : vector<2x24x32xf32>
      %246 = vector.shape_cast %81 : vector<1x32xf32> to vector<1x1x32xf32>
      %247 = vector.broadcast %246 : vector<1x1x32xf32> to vector<2x24x32xf32>
      %248 = arith.addf %245, %247 : vector<2x24x32xf32>
      scf.yield %248 : vector<2x24x32xf32>
    }
    %c2_i32_9 = arith.constant 2 : i32
    %31 = vector.extract_strided_slice %30 {offsets = [0, 0, 0], sizes = [2, 1, 32], strides = [1, 1, 1]} : vector<2x24x32xf32> to vector<2x1x32xf32>
    %32 = vector.shape_cast %31 : vector<2x1x32xf32> to vector<2x32xf32>
    %cst_10 = arith.constant dense<0.000000e+00> : vector<2xf32>
    %33 = vector.multi_reduction <add>, %32, %cst_10 [1] : vector<2x32xf32> to vector<2xf32>
    %34 = vector.shape_cast %33 : vector<2xf32> to vector<2x1xf32>
    %cst_11 = arith.constant 3.200000e+01 : f32
    %35 = vector.broadcast %cst_11 : f32 to vector<2x1xf32>
    %36 = arith.divf %34, %35 : vector<2x1xf32>
    %37 = arith.mulf %32, %32 : vector<2x32xf32>
    %cst_12 = arith.constant dense<0.000000e+00> : vector<2xf32>
    %38 = vector.multi_reduction <add>, %37, %cst_12 [1] : vector<2x32xf32> to vector<2xf32>
    %39 = vector.shape_cast %38 : vector<2xf32> to vector<2x1xf32>
    %cst_13 = arith.constant 3.200000e+01 : f32
    %40 = vector.broadcast %cst_13 : f32 to vector<2x1xf32>
    %41 = arith.divf %39, %40 : vector<2x1xf32>
    %42 = arith.mulf %36, %36 : vector<2x1xf32>
    %43 = arith.subf %41, %42 : vector<2x1xf32>
    %44 = vector.broadcast %36 : vector<2x1xf32> to vector<2x32xf32>
    %45 = arith.subf %32, %44 : vector<2x32xf32>
    %cst_14 = arith.constant 9.99999974E-6 : f32
    %46 = vector.broadcast %cst_14 : f32 to vector<2x1xf32>
    %47 = arith.addf %43, %46 : vector<2x1xf32>
    %48 = math.rsqrt %47 : vector<2x1xf32>
    %49 = vector.broadcast %48 : vector<2x1xf32> to vector<2x32xf32>
    %50 = arith.mulf %45, %49 : vector<2x32xf32>
    %51 = vector.broadcast %5 : vector<1x32xf32> to vector<2x32xf32>
    %52 = arith.mulf %50, %51 : vector<2x32xf32>
    %53 = vector.broadcast %6 : vector<1x32xf32> to vector<2x32xf32>
    %54 = arith.addf %52, %53 : vector<2x32xf32>
    %55 = arith.truncf %54 : vector<2x32xf32> to vector<2x32xbf16>
    %c0_15 = arith.constant 0 : index
    %c0_16 = arith.constant 0 : index
    %56 = vector.load %arg6[%c0_15, %c0_16] : memref<32x128xbf16, #tpu.memory_space<vmem>>, vector<32x128xbf16>
    %cst_17 = arith.constant dense<0.000000e+00> : vector<2x128xf32>
    %57 = tpu.matmul %55, %56, %cst_17 {dimension_numbers = #tpu.dot_dimension_numbers<[1], [0], [0], [1], [0, 0, 1, 1], [], []>} : vector<2x32xbf16>, vector<32x128xbf16>, vector<2x128xf32> -> vector<2x128xf32>
    %c0_18 = arith.constant 0 : index
    %c0_19 = arith.constant 0 : index
    %58 = vector.load %arg7[%c0_18, %c0_19] : memref<1x128xf32, #tpu.memory_space<vmem>>, vector<1x128xf32>
    %59 = vector.broadcast %58 : vector<1x128xf32> to vector<2x128xf32>
    %60 = arith.addf %57, %59 : vector<2x128xf32>
    %c0_20 = arith.constant 0 : index
    %c0_21 = arith.constant 0 : index
    %61 = vector.load %arg8[%c0_20, %c0_21] : memref<2x128xf32, #tpu.memory_space<vmem>>, vector<2x128xf32>
    tpu.vector_store %arg8[%c0_20, %c0_21], %60 {strides = array<i32>} : memref<2x128xf32, #tpu.memory_space<vmem>>, vector<2x128xf32>,
    return
  }
}

</mosaic_0001>

<bundles_post_ra>
// kernel: vit_forward.1
= control target key start
LH: loop header
LB: loop body
LE: loop exit
PB: predicated region body
PF: predicated region fallthrough
CT: control target
= control target key end

     0   :  { %13 = vsyncpa [#allocation3], 0  ;;  %vm80_vm0 = vcmask 523264   ;;  %v52_v10 = vlaneseq  ;;  %v3311_v12 = vmov 0.0   ;;  %vm138_vm2 = vcmask 1046528   ;;  %s4135_s0 = inlined_call_operand.vmem [shape: f32[2,16,64], index: 0, kind: input, shape index: {}]   ;;  %s4136_s1 = inlined_call_operand.vmem [shape: f32[24,32], index: 1, kind: input, shape index: {}]   ;;  %s4137_s2 = inlined_call_operand.vmem [shape: bf16[64,32], index: 2, kind: input, shape index: {}]   ;;  %s4138_s3 = inlined_call_operand.vmem [shape: bf16[2,32,256], index: 3, kind: input, shape index: {}]   ;;  %s4139_s4 = inlined_call_operand.vmem [shape: bf16[2,128,32], index: 4, kind: input, shape index: {}]   ;;  %s4140_s5 = inlined_call_operand.vmem [shape: f32[2,8,128], index: 5, kind: input, shape index: {}]   ;;  %s4141_s6 = inlined_call_operand.vmem [shape: bf16[32,128], index: 6, kind: input, shape index: {}]   ;;  %s4142_s7 = inlined_call_operand.vmem [shape: f32[1,128], index: 7, kind: input, shape index: {}]   ;;  %s4143_s8 = inlined_call_operand.hbm [shape: f32[2,128], index: 8, kind: output, shape index: {}]  }
   0x1   :  { %v3031_v0 = vld [vmem:[%s4137_s2 + $0x18] sm:$0xff]   ;;  %v3032_v1 = vld [vmem:[%s4137_s2 + $0x10] sm:$0xff]   ;;  %v34_v2 = vld [vmem:[%s4135_s0] sm:$0xff]  ;;  %vm157_vm3 = vcmask 1040384  }
   0x2   :  { %2707 = vmatprep.subr.bf16.mxu0 %v3031_v0  ;;  %v35_v3 = vld [vmem:[%s4135_s0 + $0x8] sm:$0xff]  ;;  %v3034_v6 = vld [vmem:[%s4137_s2] sm:$0xff]   ;;  %v36_v7 = vld [vmem:[%s4135_s0 + $0x10] sm:$0xff]  ;;  %v175_v11 = vand.u32 127, %v52_v10  ;;  %v3403_v14 = vshrl.u32 %v52_v10, 7 }
   0x3   :  { %2708 = vmatpush3.bf16.msra.mxu0 %v3031_v0  ;;  %v3033_v4 = vld [vmem:[%s4137_s2 + $0x8] sm:$0xff]   ;;  %v38_v5 = vpack.c.bf16 %v35_v3, %v34_v2  ;;  %v37_v8 = vld [vmem:[%s4135_s0 + $0x18] sm:$0xff]  ;;  %v31_v15 = vld [vmem:[%s4136_s1] sm:$0xff] }
   0x4   :  { %2709 = vmatprep.subr.bf16.mxu0 %v3032_v1  ;;  %v39_v9 = vpack.c.bf16 %v37_v8, %v36_v7  ;;  %vm176_vm1 = vcmp.ge.s32.totalorder %v175_v11, 17  ;;  %v32_v16 = vld [vmem:[%s4136_s1 + $0x8] sm:$0xff]  ;;  %v54_v17 = vsub.s32 2, %v3403_v14  ;;  %v3415_v18 = vld [vmem:[%s4136_s1 + $0x10] sm:$0xff]  ;;  %v49_v19 = vrot.slane %v31_v15, 7  ;;  %s3440_s1 = smov 0  }
   0x5   :  { %2715 = vmatprep.mubr.msk.bf16.mxu0 %vm80_vm0, %v38_v5  ;;  %v3401_v13 = vsel %vm176_vm1, -1e+30, %v3311_v12  ;;  %v139_v20 = vrot.slane %v31_v15, 1  ;;  %v140_v21 = vrot.slane %v32_v16, 1  ;;  %v142_v26 = vrot.slane %v3415_v18, 1 }
   0x6   :  { %v55_v22 = vrot.slane %v3415_v18, %v54_v17  ;;  %v51_v23 = vadd.f32 %v49_v19, %v3415_v18 }
   0x7   :  { %2710 = vmatpush3.bf16.msra.mxu0 %v3032_v1  ;;  %v141_v25 = vsel %vm138_vm2, %v139_v20, %v140_v21  ;;  %v143_v33 = vsel %vm138_vm2, %v140_v21, %v142_v26 }
   0x8   :  { %2711 = vmatprep.subr.bf16.mxu0 %v3033_v4  ;;  %v151_v30 = vrot.slane %v51_v23, 1 }
   0xb   :  { %2712 = vmatpush3.bf16.msra.mxu0 %v3033_v4 }
   0xc   :  { %2713 = vmatprep.subr.bf16.mxu0 %v3034_v6 }
   0xf   :  { %2714 = vmatpush3.bf16.msra.mxu0 %v3034_v6 }
  0x12   :  { %2716 = vmatmul.mubr.msk.bf16.vlgmr.msra.gmra.mxu0 %vm80_vm0, %v39_v9 }
  0xd2   :  { %v2717_v24 = vpop.f32.mrf.mxu0 }
  0xd3   :  { %v130_v27 = vadd.f32 %v2717_v24, %v55_v22 }
  0xd4   :  { %v121_v28 = vpop.f32.mrf.mxu0 }
  0xd5   :  { %v148_v29 = vadd.f32 %v141_v25, %v130_v27  ;;  %v122_v31 = vadd.f32 %v121_v28, %v55_v22 }
  0xd6   :  { %v2718_v32 = vpop.f32.mrf.mxu0 }
  0xd7   :  { %v161_v34 = vrot.slane %v148_v29, 7  ;;  %v146_v35 = vadd.f32 %v141_v25, %v122_v31  ;;  %v133_v36 = vadd.f32 %v2718_v32, %v55_v22 }
  0xd8   :  { %v124_v37 = vpop.f32.mrf.mxu0 }
  0xd9   :  { %v171_v38 = vsel %vm157_vm3, %v151_v30, %v161_v34   ;;  %v158_v39 = vrot.slane %v146_v35, 7  ;;  %v149_v40 = vadd.f32 %v143_v33, %v133_v36  ;;  %v125_v41 = vadd.f32 %v124_v37, %v55_v22 }
  0xdb   :  { %v170_v42 = vsel %vm157_vm3, %v151_v30, %v158_v39   ;;  %v162_v43 = vrot.slane %v149_v40, 7  ;;  %v147_v44 = vadd.f32 %v143_v33, %v125_v41 }
  0xdd   :  { %v163_v45 = vsel %vm157_vm3, %v161_v34, %v162_v43   ;;  %v173_v46 = vsel %vm157_vm3, %v162_v43, 0.0   ;;  %v159_v47 = vrot.slane %v147_v44, 7 }
  0xdf   :  { %v160_v48 = vsel %vm157_vm3, %v158_v39, %v159_v47   ;;  %v172_v49 = vsel %vm157_vm3, %v159_v47, 0.0  }
  0xe0 LB: > { %v3312_v50 = vmov 0.0   ;;  %s2602_s25 = sshll.u32 %s3309_s1, 5  ;;  %vm3313_vm4 = vmmov 0   ;;  %s2603_s29 = sshll.u32 %s3309_s1, 6  ;;  %vm251_vm5 = vcmask 261120   ;;  %v218_v53 = vpack.c.bf16 %v3301_v48, %v3305_v42  ;;  %s3309_s1 = sphi %s3440_s1, %s183_s1   ;;  %v3305_v42 = vphi %v170_v42, %v4148_v42   ;;  %v3301_v48 = vphi %v160_v48, %v2355_v48   ;;  %v3297_v49 = vphi %v172_v49, %v4147_v49   ;;  %v3293_v38 = vphi %v171_v38, %v4146_v38   ;;  %v3289_v45 = vphi %v163_v45, %v4145_v45   ;;  %v3285_v46 = vphi %v173_v46, %v2359_v46  }
  0xe1   : > { %2719 = vmatprep.subr.bf16.mxu1 %v3312_v50  ;;  %2723 = vmatprep.mubr.msk.bf16.mxu1 %vm3313_vm4, %v3312_v50  ;;  %s3470_s28 = scalar_lea.vmem %s4138_s3, %s2602_s25  ;;  %s3477_s10 = scalar_lea.vmem %s4139_s4, %s2603_s29  ;;  %v2604_v54 = vpack.c.bf16 %v3293_v38, %v3297_v49  ;;  %v220_v55 = vpack.c.bf16 %v3289_v45, %v3293_v38  ;;  %v221_v56 = vpack.c.bf16 %v3285_v46, %v3285_v46  ;;  %v224_v60 = vsub.s32 0, %v3403_v14 }
  0xe2   : > { %v3080_v51 = vld [vmem:[%s3470_s28 + $0x10] ss:$8 sps:$4 sm:$0xff]   ;;  %v3083_v52 = vld [vmem:[%s3470_s28] ss:$8 sps:$4 sm:$0xff]   ;;  %s2537_s11 = sshll.u32 %s3309_s1, 3  ;;  %vm328_vm6 = vcmask 64512  }
  0xe3   : > { %2720 = vmatpush3.bf16.msra.mxu1 %v3080_v51  ;;  %v234_v57 = vunpack.c.h.b16 %v220_v55  ;;  %v235_v58 = vunpack.c.l.b16 %v221_v56  ;;  %s3500_s14 = scalar_lea.vmem %s4140_s5, %s2537_s11  ;;  %s3314_s15 = smov 96   ;;  %vm467_vm7 = vcmask 195584   ;;  %vm549_vm8 = vcmask 1043456  }
  0xe4   : > { %2721 = vmatprep.subr.bf16.mxu1 %v3312_v50  ;;  %v217_v61 = vld [vmem:[%s3500_s14] sm:$0xff]  ;;  %s3315_s16 = smov 64   ;;  %s3316_s17 = smov 88   ;;  %vm1767_vm9 = vcmask 130048  }
  0xe5   : > { %v238_v59 = vpack.c.b16 %v235_v58, %v234_v57  ;;  %v225_v63 = vrot.slane %v217_v61, %v224_v60  ;;  %s3317_s18 = smov 120   ;;  %s3318_s19 = smov 56  }
  0xe6   : > { %s3319_s20 = smov 80   ;;  %s3320_s2 = smov 112  }
  0xe7   : > { %2722 = vmatpush3.bf16.msra.mxu1 %v3083_v52  ;;  %s3321_s21 = smov 48   ;;  %s3322_s22 = smov 72  }
  0xe8   : > { %s3323_s23 = smov 104   ;;  %s3324_s0 = smov 40  }
  0xe9   : > { %s3325_s24 = smov 32   ;;  %s3326_s25 = smov 16  }
  0xea   : > { %2724 = vmatmul.mubr.msk.bf16.vlgmr.msra.gmra.mxu1 %vm251_vm5, %v218_v53  ;;  %s3327_s26 = smov 8   ;;  %s3328_s27 = smov 24  }
  0xeb   : > { %2727 = vmatprep.mubr.msk.bf16.mxu1 %vm3313_vm4, %v3312_v50  ;;  %s183_s1 = sadd.s32 1, %s3309_s1  }
  0xec   : > { %p180_p0 = scmp.ge.s32.totalorder %s183_s1, 2  }
  0xed   :  { %vm2363_vm10 = vcmask (%p180_p0), 1041409   ;;  %vm2366_vm11 = vcmask (%p180_p0), 254976   ;;  %vm3329_vm12 = vmmov (%p180_p0), 0   ;;  %s3330_s29 = smov (%p180_p0), [#allocation2]  }
  0xee   :  { %s2494_s30 = sshll.u32 (%p180_p0), %s3330_s29, 4  ;;  %s2495_s30 = int_to_ptr.vmem [resolvable:$true] %s2494_s30 }
  0xef   :  { %s3233_s9 = scalar_lea.vmem (%p180_p0), %s2495_s30, 32  ;;  %p3238_p2 = scmp.lt.s32.totalorder (%p180_p0), %s2495_s30, %s2495_s30 }
  0xf0   :  { %p3234_p1 = scmp.ne.s32.totalorder (%p180_p0), %s2495_s30, %s3233_s9  ;;  %p3239_p3 = scmp.lt.s32.totalorder (%p180_p0), %s3233_s9, %s3233_s9 }
  0xf2   : > { %2728 = vmatmul.mubr.msk.bf16.gmra.mxu1 %vm251_vm5, %v2604_v54  ;;  %p3240_p4 = por (%p180_p0), %p3239_p3, %p3238_p2 }
  0xf3   : > { %2731 = vmatprep.mubr.msk.bf16.mxu1 %vm3313_vm4, %v3312_v50 }
  0xf4   :  { %p3241_p5 = pnand (%p180_p0), %p3240_p4, %p3234_p1 }
  0xfa   : > { %2732 = vmatmul.mubr.msk.bf16.gmra.mxu1 %vm251_vm5, %v238_v59 }
 0x1aa   : > { %v295_v62 = vpop.f32.mrf.mxu1 }
 0x1ab   : > { %v296_v2 = vadd.f32 %v295_v62, %v225_v63 }
 0x1ac   : > { %v2725_v0 = vpop.f32.mrf.mxu1 }
 0x1ae   : > { %v298_v1 = vpop.f32.mrf.mxu1 }
 0x1af   : > { %v299_v3 = vadd.f32 %v298_v1, %v225_v63 }
 0x1b0   : > { %v2726_v4 = vpop.f32.mrf.mxu1 }
 0x1b1   : > { %v3504_v5 = vpack.c.bf16 %v299_v3, %v296_v2 }
 0x1b2   : > { %v303_v6 = vpop.f32.mrf.mxu1 }
 0x1b3   : > { %v304_v7 = vadd.f32 %v303_v6, %v225_v63  ;;  %2739 = vmatprep.mubr.msk.bf16.mxu1 %vm328_vm6, %v3504_v5 }
 0x1b4   : > { %v2729_v8 = vpop.f32.mrf.mxu1 }
 0x1b5   : > { %v3508_v9 = vpack.c.bf16 %v304_v7, %v304_v7 }
 0x1b6   : > { %v306_v10 = vpop.f32.mrf.mxu1 }
 0x1b7   : > { %326 = vrot.lane.b32.xlu0 %v3508_v9, %s3314_s15  ;;  %v307_v16 = vadd.f32 %v306_v10, %v225_v63 }
 0x1b8   : > { %v2730_v11 = vpop.f32.mrf.mxu1 }
 0x1ba   : > { %v311_v15 = vpop.f32.mrf.mxu1 }
 0x1bb   : > { %v312_v19 = vadd.f32 %v311_v15, %v225_v63  ;;  %324 = vrot.lane.b32.xlu0 %v3504_v5, %s3314_s15 }
 0x1bc   : > { %v2733_v20 = vpop.f32.mrf.mxu1 }
 0x1bd   : > { %v3512_v21 = vpack.c.bf16 %v312_v19, %v307_v16 }
 0x1be   : > { %v314_v22 = vpop.f32.mrf.mxu1 }
 0x1bf   : > { %v315_v23 = vadd.f32 %v314_v22, %v225_v63  ;;  %2747 = vmatprep.mubr.msk.bf16.mxu0 %vm328_vm6, %v3512_v21 }
 0x1c0   : > { %v2734_v24 = vpop.f32.mrf.mxu1 }
 0x1c1   : > { %v3516_v25 = vpack.c.bf16 %v315_v23, %v315_v23 }
 0x1c3   : > { %393 = vrot.lane.b32.xlu1 %v3516_v25, %s3314_s15 }
 0x1c7   : > { %391 = vrot.lane.b32.xlu1 %v3512_v21, %s3314_s15 }
 0x229   : > { %v327_v26 = vpop.permute.xlu0 %326 }
 0x22a   : > { %2931 = vmatprep.subr.msk.bf16.mxu1 %vm328_vm6, %v327_v26  ;;  %v339_v27 = vsel %vm328_vm6, %v327_v26, 0 }
 0x22b   : > { %2736 = vmatpush3.bf16.xpose.msra.mxu1 %v339_v27 }
 0x22d   : > { %v325_v28 = vpop.permute.xlu0 %324 }
 0x22e   : > { %2932 = vmatprep.subr.msk.bf16.mxu1 %vm328_vm6, %v325_v28  ;;  %v336_v29 = vsel %vm328_vm6, %v325_v28, 0 }
 0x233   : > { %2738 = vmatpush3.bf16.xpose.msra.mxu1 %v336_v29 }
 0x235   : > { %v394_v30 = vpop.permute.xlu1 %393 }
 0x236   : > { %2933 = vmatprep.subr.msk.bf16.mxu0 %vm328_vm6, %v394_v30  ;;  %v405_v31 = vsel %vm328_vm6, %v394_v30, 0 }
 0x237   : > { %2744 = vmatpush3.bf16.xpose.msra.mxu0 %v405_v31 }
 0x239   : > { %v392_v32 = vpop.permute.xlu1 %391 }
 0x23a   : > { %2740 = vmatmul.mubr.msk.bf16.vlgmr.msra.gmra.mxu1 %vm328_vm6, %v3508_v9  ;;  %2934 = vmatprep.subr.msk.bf16.mxu0 %vm328_vm6, %v392_v32  ;;  %v402_v33 = vsel %vm328_vm6, %v392_v32, 0 }
 0x23f   : > { %2746 = vmatpush3.bf16.xpose.msra.mxu0 %v402_v33 }
 0x246   : > { %2748 = vmatmul.mubr.msk.bf16.vlgmr.msra.gmra.mxu0 %vm328_vm6, %v3516_v25 }
 0x2fa   : > { %v2741_v34 = vpop.f32.mrf.mxu1 }
 0x2fb   : > { %v457_v36 = vmul.f32 0.35355338, %v2741_v34 }
 0x2fc   : > { %v375_v35 = vpop.f32.mrf.mxu1 }
 0x2fd   : > { %v455_v37 = vmul.f32 0.35355338, %v375_v35  ;;  %v463_v43 = vadd.f32 %v457_v36, %v3401_v13 }
 0x2fe   : > { %v2742_v39 = vpop.f32.mrf.mxu1 }
 0x2ff   : > { %v461_v40 = vadd.f32 %v455_v37, %v3401_v13  ;;  %v474_v52 = vsel %vm467_vm7, %v463_v43, -inf }
 0x300   : > { %v378_v41 = vpop.f32.mrf.mxu1 }
 0x301   : > { %v456_v44 = vmul.f32 0.35355338, %v378_v41  ;;  %v468_v47 = vsel %vm467_vm7, %v461_v40, -inf }
 0x302   : > { %469 = vmax.xlane.f32.xlu0 %v468_v47 }
 0x303   : > { %v462_v51 = vadd.f32 %v456_v44, %v3401_v13 }
 0x305   : > { %v471_v53 = vsel %vm467_vm7, %v462_v51, -inf }
 0x306   : > { %v2749_v54 = vpop.f32.mrf.mxu0  ;;  %475 = vmax.xlane.f32.xlu0 %v474_v52  ;;  %472 = vmax.xlane.f32.xlu1 %v471_v53 }
 0x307   : > { %v460_v56 = vmul.f32 0.35355338, %v2749_v54 }
 0x308   : > { %v441_v55 = vpop.f32.mrf.mxu0 }
 0x309   : > { %v458_v57 = vmul.f32 0.35355338, %v441_v55  ;;  %v466_v60 = vadd.f32 %v460_v56, %v3401_v13 }
 0x30a   : > { %v2750_v58 = vpop.f32.mrf.mxu0 }
 0x30b   : > { %v464_v59 = vadd.f32 %v458_v57, %v3401_v13  ;;  %v483_v62 = vsel %vm467_vm7, %v466_v60, -inf }
 0x30c   : > { %v444_v63 = vpop.f32.mrf.mxu0 }
 0x30d   : > { %v477_v61 = vsel %vm467_vm7, %v464_v59, -inf  ;;  %v459_v0 = vmul.f32 0.35355338, %v444_v63 }
 0x30e   : > { %478 = vmax.xlane.f32.xlu0 %v477_v61 }
 0x30f   : > { %v465_v1 = vadd.f32 %v459_v0, %v3401_v13 }
 0x311   : > { %v480_v2 = vsel %vm467_vm7, %v465_v1, -inf }
 0x312   : > { %484 = vmax.xlane.f32.xlu0 %v483_v62 }
 0x317   : > { %540 = vrot.lane.b32.xlu1 %v3508_v9, %s3315_s16 }
 0x31b   : > { %669 = vrot.lane.b32.xlu1 %v3508_v9, %s3316_s17 }
 0x328   : > { %538 = vrot.lane.b32.xlu0 %v3504_v5, %s3315_s16 }
 0x32c   : > { %601 = vrot.lane.b32.xlu0 %v3512_v21, %s3315_s16 }
 0x33f   : > { %481 = vmax.xlane.f32.xlu1 %v480_v2 }
 0x350   : > { %603 = vrot.lane.b32.xlu1 %v3516_v25, %s3315_s16 }
 0x38b   : > { %v470_v3 = vpop.xlane.xlu0 %469 }
 0x38c   : > { %v486_v4 = vsub.f32 %v461_v40, %v470_v3 }
 0x38e   : > { %v492_v11 = vmul.f32 1.442695, %v486_v4 }
 0x38f   : > { %v476_v6 = vpop.xlane.xlu0 %475  ;;  %v473_v7 = vpop.xlane.xlu1 %472 }
 0x390   : > { %v488_v8 = vsub.f32 %v463_v43, %v476_v6  ;;  %v487_v10 = vsub.f32 %v462_v51, %v473_v7 }
 0x392   : > { %v496_v15 = vmul.f32 1.442695, %v488_v8  ;;  %v494_v16 = vmul.f32 1.442695, %v487_v10 }
 0x393   : > { %v541_v19 = vpop.permute.xlu1 %540 }
 0x394   : > { %3094 = vpow2.f32 %v496_v15  ;;  %2935 = vmatprep.subr.msk.bf16.mxu1 %vm549_vm8, %v541_v19  ;;  %v551_v20 = vsel %vm549_vm8, %v541_v19, 0 }
 0x395   : > { %3096 = vpow2.f32 %v494_v16  ;;  %2752 = vmatpush3.bf16.msra.mxu1 %v551_v20 }
 0x396   : > { %3098 = vpow2.f32 %v492_v11 }
 0x397   : > { %v479_v22 = vpop.xlane.xlu0 %478  ;;  %v670_v23 = vpop.permute.xlu1 %669 }
 0x398   : > { %2937 = vmatprep.subr.msk.bf16.mxu0 %vm328_vm6, %v670_v23  ;;  %v681_v24 = vsel %vm328_vm6, %v670_v23, 0  ;;  %v489_v26 = vsub.f32 %v464_v59, %v479_v22 }
 0x399   : > { %2768 = vmatpush3.bf16.xpose.msra.mxu0 %v681_v24 }
 0x39a   : > { %v498_v29 = vmul.f32 1.442695, %v489_v26 }
 0x39b   : > { %v485_v27 = vpop.xlane.xlu0 %484 }
 0x39c   : > { %v491_v28 = vsub.f32 %v466_v60, %v485_v27 }
 0x39e   : > { %v502_v30 = vmul.f32 1.442695, %v491_v28 }
 0x39f   : > { %v539_v31 = vpop.permute.xlu0 %538 }
 0x3a0   : > { %3100 = vpow2.f32 %v502_v30  ;;  %2753 = vmatprep.subr.bf16.mxu1 %v539_v31 }
 0x3a1   : > { %v3095_v32 = vpop.eup %3094  ;;  %2754 = vmatpush3.bf16.msra.mxu1 %v539_v31  ;;  %3102 = vpow2.f32 %v498_v29 }
 0x3a2   : > { %v3097_v33 = vpop.eup %3096  ;;  %v510_v34 = vsel %vm467_vm7, %v3095_v32, 0.0 }
 0x3a3   : > { %v3099_v35 = vpop.eup %3098  ;;  %511 = vadd.xlane.f32.xlu1 %v510_v34  ;;  %v507_v36 = vsel %vm467_vm7, %v3097_v33, 0.0  ;;  %v602_v55 = vpop.permute.xlu0 %601 }
 0x3a4   : > { %508 = vadd.xlane.f32.xlu0 %v507_v36  ;;  %v504_v37 = vsel %vm467_vm7, %v3099_v35, 0.0 }
 0x3a7   : > { %505 = vadd.xlane.f32.xlu1 %v504_v37 }
 0x3ad   : > { %v3557_v39 = vpop.eup %3100 }
 0x3ae   : > { %v519_v40 = vsel %vm467_vm7, %v3557_v39, 0.0  ;;  %v3103_v41 = vpop.eup %3102 }
 0x3af   : > { %520 = vadd.xlane.f32.xlu0 %v519_v40  ;;  %v513_v43 = vsel %vm467_vm7, %v3103_v41, 0.0 }
 0x3b3   : > { %514 = vadd.xlane.f32.xlu0 %v513_v43 }
 0x3b8   : > { %667 = vrot.lane.b32.xlu1 %v3504_v5, %s3316_s17 }
 0x3c8   : > { %v482_v44 = vpop.xlane.xlu1 %481 }
 0x3c9   : > { %v490_v47 = vsub.f32 %v465_v1, %v482_v44  ;;  %737 = vrot.lane.b32.xlu0 %v3516_v25, %s3316_s17 }
 0x3cb   : > { %v500_v51 = vmul.f32 1.442695, %v490_v47 }
 0x3cc   : > { %v604_v52 = vpop.permute.xlu1 %603 }
 0x3cd   : > { %3104 = vpow2.f32 %v500_v51  ;;  %665 = vrot.lane.b32.xlu0 %v3508_v9, %s3317_s18  ;;  %2936 = vmatprep.subr.msk.bf16.mxu1 %vm549_vm8, %v604_v52  ;;  %v613_v8 = vsel %vm549_vm8, %v604_v52, 0 }
 0x3d1   : > { %731 = vrot.lane.b32.xlu0 %v3512_v21, %s3317_s18 }
 0x3da   : > { %v3105_v53 = vpop.eup %3104 }
 0x3db   : > { %v516_v54 = vsel %vm467_vm7, %v3105_v53, 0.0 }
 0x3dc   : > { %517 = vadd.xlane.f32.xlu1 %v516_v54 }
 0x3ed   : > { %663 = vrot.lane.b32.xlu1 %v3504_v5, %s3317_s18 }
 0x3f1   : > { %735 = vrot.lane.b32.xlu1 %v3512_v21, %s3316_s17 }
 0x3f5   : > { %733 = vrot.lane.b32.xlu1 %v3516_v25, %s3317_s18 }
 0x42c   : > { %v512_v56 = vpop.xlane.xlu1 %511 }
 0x42d   : > { %v509_v57 = vpop.xlane.xlu0 %508  ;;  %3106 = vrcp.f32 %v512_v56 }
 0x42e   : > { %3108 = vrcp.f32 %v509_v57 }
 0x430   : > { %v506_v58 = vpop.xlane.xlu1 %505 }
 0x431   : > { %3110 = vrcp.f32 %v506_v58 }
 0x434   : > { %v668_v59 = vpop.permute.xlu1 %667 }
 0x435   : > { %2938 = vmatprep.subr.msk.bf16.mxu0 %vm328_vm6, %v668_v59  ;;  %v678_v60 = vsel %vm328_vm6, %v668_v59, 0 }
 0x436   : > { %2770 = vmatpush3.bf16.xpose.msra.mxu0 %v678_v60 }
 0x438   : > { %v521_v63 = vpop.xlane.xlu0 %520 }
 0x439   : > { %3112 = vrcp.f32 %v521_v63 }
 0x43a   : > { %v3107_v61 = vpop.eup %3106 }
 0x43b   : > { %v3109_v62 = vpop.eup %3108  ;;  %v527_v1 = vmul.f32 %v3107_v61, %v3095_v32 }
 0x43c   : > { %v525_v3 = vmul.f32 %v3109_v62, %v3097_v33  ;;  %v515_v7 = vpop.xlane.xlu0 %514 }
 0x43d   : > { %v535_v6 = vpack.c.bf16 %v527_v1, %v527_v1  ;;  %3114 = vrcp.f32 %v515_v7 }
 0x43e   : > { %v3111_v0 = vpop.eup %3110 }
 0x43f   : > { %v523_v2 = vmul.f32 %v3111_v0, %v3099_v35 }
 0x440   : > { %v738_v10 = vpop.permute.xlu0 %737 }
 0x441   : > { %v534_v4 = vpack.c.bf16 %v525_v3, %v523_v2  ;;  %v749_v30 = vsel %vm328_vm6, %v738_v10, 0 }
 0x443   : > { %2755 = vmatprep.mubr.msk.bf16.mxu1 %vm467_vm7, %v534_v4 }
 0x444   : > { %2756 = vmatmul.mubr.msk.bf16.vlgmr.msra.gmra.mxu1 %vm467_vm7, %v535_v6  ;;  %v666_v16 = vpop.permute.xlu0 %665 }
 0x445   : > { %2760 = vmatpush3.bf16.msra.mxu1 %v613_v8 }
 0x446   : > { %2761 = vmatprep.subr.bf16.mxu1 %v602_v55  ;;  %v3113_v19 = vpop.eup %3112 }
 0x447   : > { %v533_v23 = vmul.f32 %v3113_v19, %v3557_v39 }
 0x448   : > { %v732_v29 = vpop.permute.xlu0 %731 }
 0x449   : > { %2762 = vmatpush3.bf16.msra.mxu1 %v602_v55  ;;  %v537_v28 = vpack.c.bf16 %v533_v23, %v533_v23 }
 0x44a   : > { %2939 = vmatprep.subr.msk.bf16.mxu1 %vm328_vm6, %v738_v10  ;;  %v3115_v20 = vpop.eup %3114 }
 0x44b   : > { %v529_v24 = vmul.f32 %v3115_v20, %v3103_v41 }
 0x465   : > { %v518_v11 = vpop.xlane.xlu1 %517 }
 0x466   : > { %3116 = vrcp.f32 %v518_v11 }
 0x469   : > { %v664_v15 = vpop.permute.xlu1 %663 }
 0x46a   : > { %2771 = vmatprep.mubr.msk.bf16.mxu0 %vm328_vm6, %v664_v15 }
 0x46b   : > { %2772 = vmatmul.mubr.msk.bf16.vlgmr.msra.gmra.mxu0 %vm328_vm6, %v666_v16 }
 0x46d   : > { %v736_v31 = vpop.permute.xlu1 %735 }
 0x46e   : > { %v746_v32 = vsel %vm328_vm6, %v736_v31, 0 }
 0x471   : > { %v734_v33 = vpop.permute.xlu1 %733 }
 0x473   : > { %v3117_v22 = vpop.eup %3116 }
 0x474   : > { %v531_v26 = vmul.f32 %v3117_v22, %v3105_v53 }
 0x476   : > { %v536_v27 = vpack.c.bf16 %v531_v26, %v529_v24 }
 0x478   : > { %2763 = vmatprep.mubr.msk.bf16.mxu1 %vm467_vm7, %v536_v27 }
 0x479   : > { %2764 = vmatmul.mubr.msk.bf16.vlgmr.msra.gmra.mxu1 %vm467_vm7, %v537_v28 }
 0x47a   : > { %2776 = vmatpush3.bf16.xpose.msra.mxu1 %v749_v30  ;;  %2779 = vmatprep.mubr.msk.bf16.mxu1 %vm328_vm6, %v732_v29 }
 0x47b   : > { %2940 = vmatprep.subr.msk.bf16.mxu1 %vm328_vm6, %v736_v31 }
 0x482   : > { %2778 = vmatpush3.bf16.xpose.msra.mxu1 %v746_v32 }
 0x489   : > { %2780 = vmatmul.mubr.msk.bf16.vlgmr.msra.gmra.mxu1 %vm328_vm6, %v734_v33 }
 0x504   : > { %v3590_v34 = vpop.f32.mrf.mxu1 }
 0x506   : > { %v3592_v35 = vpop.f32.mrf.mxu1 }
 0x508   : > { %v2758_v36 = vpop.f32.mrf.mxu1 }
 0x50a   : > { %v3600_v57 = vpop.f32.mrf.mxu1 }
 0x52b   : > { %v2773_v37 = vpop.f32.mrf.mxu0 }
 0x52c   : > { %v801_v40 = vmul.f32 0.35355338, %v2773_v37 }
 0x52d   : > { %v717_v39 = vpop.f32.mrf.mxu0 }
 0x52e   : > { %v799_v41 = vmul.f32 0.35355338, %v717_v39  ;;  %v807_v51 = vadd.f32 %v801_v40, %v3401_v13 }
 0x52f   : > { %v2774_v43 = vpop.f32.mrf.mxu0 }
 0x530   : > { %v805_v44 = vadd.f32 %v799_v41, %v3401_v13  ;;  %v817_v55 = vsel %vm467_vm7, %v807_v51, -inf }
 0x531   : > { %v720_v47 = vpop.f32.mrf.mxu0 }
 0x532   : > { %v800_v52 = vmul.f32 0.35355338, %v720_v47  ;;  %v811_v53 = vsel %vm467_vm7, %v805_v44, -inf }
 0x533   : > { %812 = vmax.xlane.f32.xlu0 %v811_v53 }
 0x534   : > { %v806_v54 = vadd.f32 %v800_v52, %v3401_v13 }
 0x536   : > { %v814_v56 = vsel %vm467_vm7, %v806_v54, -inf }
 0x537   : > { %818 = vmax.xlane.f32.xlu0 %v817_v55  ;;  %815 = vmax.xlane.f32.xlu1 %v814_v56 }
 0x539   : > { %v3602_v58 = vpop.f32.mrf.mxu1 }
 0x53b   : > { %v3604_v59 = vpop.f32.mrf.mxu1 }
 0x53d   : > { %v2766_v60 = vpop.f32.mrf.mxu1 }
 0x53f   : > { %v3606_v61 = vpop.f32.mrf.mxu1 }
 0x549   : > { %v2781_v62 = vpop.f32.mrf.mxu1 }
 0x54a   : > { %v804_v0 = vmul.f32 0.35355338, %v2781_v62 }
 0x54b   : > { %v785_v63 = vpop.f32.mrf.mxu1 }
 0x54c   : > { %v802_v1 = vmul.f32 0.35355338, %v785_v63  ;;  %v810_v6 = vadd.f32 %v804_v0, %v3401_v13 }
 0x54d   : > { %v2782_v2 = vpop.f32.mrf.mxu1 }
 0x54e   : > { %v808_v3 = vadd.f32 %v802_v1, %v3401_v13  ;;  %v826_v11 = vsel %vm467_vm7, %v810_v6, -inf }
 0x54f   : > { %v788_v4 = vpop.f32.mrf.mxu1 }
 0x550   : > { %v803_v7 = vmul.f32 0.35355338, %v788_v4  ;;  %v820_v8 = vsel %vm467_vm7, %v808_v3, -inf }
 0x551   : > { %821 = vmax.xlane.f32.xlu0 %v820_v8 }
 0x552   : > { %v809_v10 = vadd.f32 %v803_v7, %v3401_v13 }
 0x554   : > { %v823_v15 = vsel %vm467_vm7, %v809_v10, -inf }
 0x555   : > { %827 = vmax.xlane.f32.xlu0 %v826_v11  ;;  %824 = vmax.xlane.f32.xlu1 %v823_v15 }
 0x5bc   : > { %v813_v16 = vpop.xlane.xlu0 %812 }
 0x5bd   : > { %v829_v19 = vsub.f32 %v805_v44, %v813_v16 }
 0x5bf   : > { %v835_v20 = vmul.f32 1.442695, %v829_v19 }
 0x5c0   : > { %v819_v22 = vpop.xlane.xlu0 %818  ;;  %v816_v23 = vpop.xlane.xlu1 %815 }
 0x5c1   : > { %3118 = vpow2.f32 %v835_v20  ;;  %v831_v24 = vsub.f32 %v807_v51, %v819_v22  ;;  %v830_v26 = vsub.f32 %v806_v54, %v816_v23 }
 0x5c3   : > { %v839_v27 = vmul.f32 1.442695, %v831_v24  ;;  %v837_v28 = vmul.f32 1.442695, %v830_v26 }
 0x5c5   : > { %3120 = vpow2.f32 %v839_v27 }
 0x5c6   : > { %3122 = vpow2.f32 %v837_v28 }
 0x5ce   : > { %v3614_v29 = vpop.eup %3118 }
 0x5cf   : > { %v847_v30 = vsel %vm467_vm7, %v3614_v29, 0.0 }
 0x5d0   : > { %848 = vadd.xlane.f32.xlu1 %v847_v30 }
 0x5d2   : > { %v3618_v31 = vpop.eup %3120 }
 0x5d3   : > { %v3620_v32 = vpop.eup %3122  ;;  %v853_v33 = vsel %vm467_vm7, %v3618_v31, 0.0 }
 0x5d4   : > { %854 = vadd.xlane.f32.xlu1 %v853_v33  ;;  %v850_v36 = vsel %vm467_vm7, %v3620_v32, 0.0 }
 0x5d5   : > { %851 = vadd.xlane.f32.xlu0 %v850_v36 }
 0x5da   : > { %v822_v37 = vpop.xlane.xlu0 %821 }
 0x5db   : > { %v832_v41 = vsub.f32 %v808_v3, %v822_v37 }
 0x5dd   : > { %v841_v51 = vmul.f32 1.442695, %v832_v41 }
 0x5de   : > { %v828_v39 = vpop.xlane.xlu0 %827  ;;  %v825_v44 = vpop.xlane.xlu1 %824 }
 0x5df   : > { %v834_v40 = vsub.f32 %v810_v6, %v828_v39  ;;  %v833_v47 = vsub.f32 %v809_v10, %v825_v44 }
 0x5e1   : > { %v845_v43 = vmul.f32 1.442695, %v834_v40  ;;  %v843_v52 = vmul.f32 1.442695, %v833_v47 }
 0x5e3   : > { %3124 = vpow2.f32 %v845_v43 }
 0x5e4   : > { %3126 = vpow2.f32 %v841_v51 }
 0x5e5   : > { %883 = vrot.lane.b32.xlu1 %v3508_v9, %s3318_s19  ;;  %3128 = vpow2.f32 %v843_v52 }
 0x5e9   : > { %1011 = vrot.lane.b32.xlu1 %v3508_v9, %s3319_s20 }
 0x5eb   : > { %881 = vrot.lane.b32.xlu0 %v3504_v5, %s3318_s19 }
 0x5ed   : > { %945 = vrot.lane.b32.xlu1 %v3516_v25, %s3318_s19 }
 0x5ef   : > { %943 = vrot.lane.b32.xlu0 %v3512_v21, %s3318_s19 }
 0x5f0   : > { %v3632_v53 = vpop.eup %3124 }
 0x5f1   : > { %1009 = vrot.lane.b32.xlu1 %v3504_v5, %s3319_s20  ;;  %v862_v54 = vsel %vm467_vm7, %v3632_v53, 0.0  ;;  %v3636_v55 = vpop.eup %3126 }
 0x5f2   : > { %v3638_v56 = vpop.eup %3128  ;;  %v856_v60 = vsel %vm467_vm7, %v3636_v55, 0.0 }
 0x5f3   : > { %v859_v62 = vsel %vm467_vm7, %v3638_v56, 0.0 }
 0x60e   : > { %863 = vadd.xlane.f32.xlu0 %v862_v54 }
 0x612   : > { %857 = vadd.xlane.f32.xlu0 %v856_v60 }
 0x615   : > { %860 = vadd.xlane.f32.xlu1 %v859_v62 }
 0x626   : > { %1005 = vrot.lane.b32.xlu1 %v3504_v5, %s3320_s2 }
 0x628   : > { %1079 = vrot.lane.b32.xlu0 %v3516_v25, %s3319_s20 }
 0x62a   : > { %1077 = vrot.lane.b32.xlu1 %v3512_v21, %s3319_s20 }
 0x62c   : > { %1007 = vrot.lane.b32.xlu0 %v3508_v9, %s3320_s2 }
 0x62e   : > { %1075 = vrot.lane.b32.xlu1 %v3516_v25, %s3320_s2 }
 0x630   : > { %1073 = vrot.lane.b32.xlu0 %v3512_v21, %s3320_s2 }
 0x659   : > { %v849_v63 = vpop.xlane.xlu1 %848 }
 0x65a   : > { %3130 = vrcp.f32 %v849_v63 }
 0x65d   : > { %v855_v0 = vpop.xlane.xlu1 %854 }
 0x65e   : > { %v852_v1 = vpop.xlane.xlu0 %851  ;;  %3132 = vrcp.f32 %v855_v0 }
 0x65f   : > { %3134 = vrcp.f32 %v852_v1 }
 0x661   : > { %v884_v2 = vpop.permute.xlu1 %883 }
 0x662   : > { %v893_v3 = vsel %vm549_vm8, %v884_v2, 0  ;;  %2941 = vmatprep.subr.msk.bf16.mxu0 %vm549_vm8, %v884_v2  ;;  %v882_v4 = vpop.permute.xlu0 %881 }
 0x663   : > { %2784 = vmatpush3.bf16.msra.mxu0 %v893_v3 }
 0x664   : > { %2785 = vmatprep.subr.bf16.mxu0 %v882_v4 }
 0x665   : > { %v1012_v6 = vpop.permute.xlu1 %1011 }
 0x666   : > { %v944_v15 = vpop.permute.xlu0 %943  ;;  %v1023_v26 = vsel %vm328_vm6, %v1012_v6, 0 }
 0x667   : > { %2786 = vmatpush3.bf16.msra.mxu0 %v882_v4  ;;  %v3131_v8 = vpop.eup %3130 }
 0x668   : > { %2943 = vmatprep.subr.msk.bf16.mxu0 %vm328_vm6, %v1012_v6  ;;  %v866_v20 = vmul.f32 %v3131_v8, %v3614_v29 }
 0x669   : > { %v946_v7 = vpop.permute.xlu1 %945 }
 0x66a   : > { %v955_v10 = vsel %vm549_vm8, %v946_v7, 0  ;;  %2942 = vmatprep.subr.msk.bf16.mxu1 %vm549_vm8, %v946_v7 }
 0x66b   : > { %v3133_v11 = vpop.eup %3132  ;;  %2792 = vmatpush3.bf16.msra.mxu1 %v955_v10 }
 0x66c   : > { %v3135_v16 = vpop.eup %3134  ;;  %2793 = vmatprep.subr.bf16.mxu1 %v944_v15  ;;  %v870_v19 = vmul.f32 %v3133_v11, %v3618_v31 }
 0x66d   : > { %v868_v22 = vmul.f32 %v3135_v16, %v3620_v32  ;;  %v1010_v27 = vpop.permute.xlu1 %1009 }
 0x66e   : > { %v878_v23 = vpack.c.bf16 %v870_v19, %v870_v19  ;;  %v1020_v28 = vsel %vm328_vm6, %v1010_v27, 0 }
 0x66f   : > { %2794 = vmatpush3.bf16.msra.mxu1 %v944_v15  ;;  %v877_v24 = vpack.c.bf16 %v868_v22, %v866_v20 }
 0x671   : > { %2787 = vmatprep.mubr.msk.bf16.mxu0 %vm467_vm7, %v877_v24 }
 0x672   : > { %2788 = vmatmul.mubr.msk.bf16.vlgmr.msra.gmra.mxu0 %vm467_vm7, %v878_v23 }
 0x673   : > { %2800 = vmatpush3.bf16.xpose.msra.mxu0 %v1023_v26 }
 0x674   : > { %2944 = vmatprep.subr.msk.bf16.mxu0 %vm328_vm6, %v1010_v27 }
 0x67b   : > { %2802 = vmatpush3.bf16.xpose.msra.mxu0 %v1020_v28 }
 0x697   : > { %v864_v30 = vpop.xlane.xlu0 %863 }
 0x698   : > { %3136 = vrcp.f32 %v864_v30 }
 0x69b   : > { %v858_v29 = vpop.xlane.xlu0 %857 }
 0x69c   : > { %3138 = vrcp.f32 %v858_v29 }
 0x69e   : > { %v861_v31 = vpop.xlane.xlu1 %860 }
 0x69f   : > { %v1080_v32 = vpop.permute.xlu0 %1079  ;;  %3140 = vrcp.f32 %v861_v31 }
 0x6a0   : > { %2945 = vmatprep.subr.msk.bf16.mxu1 %vm328_vm6, %v1080_v32  ;;  %v1091_v52 = vsel %vm328_vm6, %v1080_v32, 0 }
 0x6a2   : > { %v1006_v33 = vpop.permute.xlu1 %1005 }
 0x6a3   : > { %v1008_v36 = vpop.permute.xlu0 %1007  ;;  %2803 = vmatprep.mubr.msk.bf16.mxu0 %vm328_vm6, %v1006_v33 }
 0x6a4   : > { %2804 = vmatmul.mubr.msk.bf16.vlgmr.msra.gmra.mxu0 %vm328_vm6, %v1008_v36 }
 0x6a5   : > { %v3137_v37 = vpop.eup %3136 }
 0x6a6   : > { %v876_v41 = vmul.f32 %v3137_v37, %v3632_v53  ;;  %v1078_v60 = vpop.permute.xlu1 %1077 }
 0x6a7   : > { %v1074_v54 = vpop.permute.xlu0 %1073  ;;  %v1088_v53 = vsel %vm328_vm6, %v1078_v60, 0 }
 0x6a8   : > { %v880_v51 = vpack.c.bf16 %v876_v41, %v876_v41 }
 0x6a9   : > { %v3139_v39 = vpop.eup %3138 }
 0x6aa   : > { %v872_v43 = vmul.f32 %v3139_v39, %v3636_v55  ;;  %v1076_v55 = vpop.permute.xlu1 %1075 }
 0x6ac   : > { %v3141_v40 = vpop.eup %3140 }
 0x6ad   : > { %v874_v44 = vmul.f32 %v3141_v40, %v3638_v56 }
 0x6af   : > { %v879_v47 = vpack.c.bf16 %v874_v44, %v872_v43 }
 0x6b1   : > { %2795 = vmatprep.mubr.msk.bf16.mxu1 %vm467_vm7, %v879_v47 }
 0x6b2   : > { %2796 = vmatmul.mubr.msk.bf16.vlgmr.msra.gmra.mxu1 %vm467_vm7, %v880_v51 }
 0x6b3   : > { %2808 = vmatpush3.bf16.xpose.msra.mxu1 %v1091_v52  ;;  %2811 = vmatprep.mubr.msk.bf16.mxu1 %vm328_vm6, %v1074_v54 }
 0x6b4   : > { %2946 = vmatprep.subr.msk.bf16.mxu1 %vm328_vm6, %v1078_v60 }
 0x6bb   : > { %2810 = vmatpush3.bf16.xpose.msra.mxu1 %v1088_v53 }
 0x6c2   : > { %2812 = vmatmul.mubr.msk.bf16.vlgmr.msra.gmra.mxu1 %vm328_vm6, %v1076_v55 }
 0x732   : > { %v3676_v56 = vpop.f32.mrf.mxu0 }
 0x734   : > { %v3678_v62 = vpop.f32.mrf.mxu0 }
 0x736   : > { %v2790_v63 = vpop.f32.mrf.mxu0 }
 0x738   : > { %v3680_v0 = vpop.f32.mrf.mxu0 }
 0x739   : > { %v3035_v1 = vpack.i.bf16 %v3680_v0, %v3678_v62 }
 0x764   : > { %v2805_v2 = vpop.f32.mrf.mxu0 }
 0x765   : > { %v1143_v4 = vmul.f32 0.35355338, %v2805_v2 }
 0x766   : > { %v1059_v3 = vpop.f32.mrf.mxu0 }
 0x767   : > { %v1141_v6 = vmul.f32 0.35355338, %v1059_v3  ;;  %v1149_v11 = vadd.f32 %v1143_v4, %v3401_v13 }
 0x768   : > { %v2806_v7 = vpop.f32.mrf.mxu0 }
 0x769   : > { %v1147_v8 = vadd.f32 %v1141_v6, %v3401_v13  ;;  %v1159_v20 = vsel %vm467_vm7, %v1149_v11, -inf }
 0x76a   : > { %v1062_v10 = vpop.f32.mrf.mxu0 }
 0x76b   : > { %v1142_v15 = vmul.f32 0.35355338, %v1062_v10  ;;  %v1153_v16 = vsel %vm467_vm7, %v1147_v8, -inf }
 0x76c   : > { %1154 = vmax.xlane.f32.xlu0 %v1153_v16 }
 0x76d   : > { %v1148_v19 = vadd.f32 %v1142_v15, %v3401_v13 }
 0x76f   : > { %v1156_v22 = vsel %vm467_vm7, %v1148_v19, -inf }
 0x770   : > { %1160 = vmax.xlane.f32.xlu0 %v1159_v20  ;;  %1157 = vmax.xlane.f32.xlu1 %v1156_v22 }
 0x772   : > { %v3690_v23 = vpop.f32.mrf.mxu1 }
 0x774   : > { %v3692_v24 = vpop.f32.mrf.mxu1 }
 0x776   : > { %v2798_v26 = vpop.f32.mrf.mxu1 }
 0x778   : > { %v3694_v27 = vpop.f32.mrf.mxu1 }
 0x779   : > { %v3060_v28 = vpack.i.bf16 %v3690_v23, %v3694_v27 }
 0x782   : > { %v2813_v30 = vpop.f32.mrf.mxu1 }
 0x783   : > { %v1146_v31 = vmul.f32 0.35355338, %v2813_v30 }
 0x784   : > { %v1127_v29 = vpop.f32.mrf.mxu1 }
 0x785   : > { %v1144_v32 = vmul.f32 0.35355338, %v1127_v29  ;;  %v1152_v39 = vadd.f32 %v1146_v31, %v3401_v13 }
 0x786   : > { %v2814_v33 = vpop.f32.mrf.mxu1 }
 0x787   : > { %v1150_v36 = vadd.f32 %v1144_v32, %v3401_v13  ;;  %v1168_v44 = vsel %vm467_vm7, %v1152_v39, -inf }
 0x788   : > { %v1130_v37 = vpop.f32.mrf.mxu1 }
 0x789   : > { %v1145_v40 = vmul.f32 0.35355338, %v1130_v37  ;;  %v1162_v41 = vsel %vm467_vm7, %v1150_v36, -inf }
 0x78a   : > { %1163 = vmax.xlane.f32.xlu0 %v1162_v41 }
 0x78b   : > { %v1151_v43 = vadd.f32 %v1145_v40, %v3401_v13 }
 0x78d   : > { %v1165_v47 = vsel %vm467_vm7, %v1151_v43, -inf }
 0x78e   : > { %1169 = vmax.xlane.f32.xlu0 %v1168_v44  ;;  %1166 = vmax.xlane.f32.xlu1 %v1165_v47 }
 0x7f5   : > { %v1155_v51 = vpop.xlane.xlu0 %1154 }
 0x7f6   : > { %v1171_v52 = vsub.f32 %v1147_v8, %v1155_v51 }
 0x7f8   : > { %v1177_v54 = vmul.f32 1.442695, %v1171_v52 }
 0x7f9   : > { %v1161_v60 = vpop.xlane.xlu0 %1160  ;;  %v1158_v53 = vpop.xlane.xlu1 %1157 }
 0x7fa   : > { %3142 = vpow2.f32 %v1177_v54  ;;  %v1173_v55 = vsub.f32 %v1149_v11, %v1161_v60  ;;  %v1172_v63 = vsub.f32 %v1148_v19, %v1158_v53 }
 0x7fc   : > { %v1181_v2 = vmul.f32 1.442695, %v1173_v55  ;;  %v1179_v3 = vmul.f32 1.442695, %v1172_v63 }
 0x7fe   : > { %3144 = vpow2.f32 %v1181_v2 }
 0x7ff   : > { %3146 = vpow2.f32 %v1179_v3 }
 0x807   : > { %v3704_v4 = vpop.eup %3142 }
 0x808   : > { %v1189_v6 = vsel %vm467_vm7, %v3704_v4, 0.0 }
 0x809   : > { %1190 = vadd.xlane.f32.xlu1 %v1189_v6 }
 0x80b   : > { %v3708_v7 = vpop.eup %3144 }
 0x80c   : > { %v3710_v10 = vpop.eup %3146  ;;  %v1195_v8 = vsel %vm467_vm7, %v3708_v7, 0.0 }
 0x80d   : > { %1196 = vadd.xlane.f32.xlu1 %v1195_v8  ;;  %v1192_v11 = vsel %vm467_vm7, %v3710_v10, 0.0 }
 0x80e   : > { %1193 = vadd.xlane.f32.xlu0 %v1192_v11 }
 0x813   : > { %v1164_v15 = vpop.xlane.xlu0 %1163 }
 0x814   : > { %v1174_v20 = vsub.f32 %v1150_v36, %v1164_v15 }
 0x816   : > { %v1183_v29 = vmul.f32 1.442695, %v1174_v20 }
 0x817   : > { %v1170_v16 = vpop.xlane.xlu0 %1169  ;;  %v1167_v26 = vpop.xlane.xlu1 %1166 }
 0x818   : > { %v1176_v19 = vsub.f32 %v1152_v39, %v1170_v16  ;;  %v1175_v30 = vsub.f32 %v1151_v43, %v1167_v26 }
 0x81a   : > { %v1187_v22 = vmul.f32 1.442695, %v1176_v19  ;;  %v1185_v31 = vmul.f32 1.442695, %v1175_v30 }
 0x81c   : > { %3148 = vpow2.f32 %v1187_v22 }
 0x81d   : > { %3150 = vpow2.f32 %v1183_v29 }
 0x81e   : > { %1225 = vrot.lane.b32.xlu1 %v3508_v9, %s3321_s21  ;;  %3152 = vpow2.f32 %v1185_v31 }
 0x822   : > { %1353 = vrot.lane.b32.xlu1 %v3508_v9, %s3322_s22 }
 0x824   : > { %1223 = vrot.lane.b32.xlu0 %v3504_v5, %s3321_s21 }
 0x826   : > { %1287 = vrot.lane.b32.xlu1 %v3516_v25, %s3321_s21 }
 0x828   : > { %1285 = vrot.lane.b32.xlu0 %v3512_v21, %s3321_s21 }
 0x829   : > { %v3722_v32 = vpop.eup %3148 }
 0x82a   : > { %1351 = vrot.lane.b32.xlu1 %v3504_v5, %s3322_s22  ;;  %v1204_v33 = vsel %vm467_vm7, %v3722_v32, 0.0  ;;  %v3726_v37 = vpop.eup %3150 }
 0x82b   : > { %v3728_v40 = vpop.eup %3152  ;;  %v1198_v36 = vsel %vm467_vm7, %v3726_v37, 0.0 }
 0x82c   : > { %v1201_v39 = vsel %vm467_vm7, %v3728_v40, 0.0 }
 0x847   : > { %1205 = vadd.xlane.f32.xlu0 %v1204_v33 }
 0x84b   : > { %1199 = vadd.xlane.f32.xlu0 %v1198_v36 }
 0x84e   : > { %1202 = vadd.xlane.f32.xlu1 %v1201_v39 }
 0x85f   : > { %1347 = vrot.lane.b32.xlu1 %v3504_v5, %s3323_s23 }
 0x861   : > { %1421 = vrot.lane.b32.xlu0 %v3516_v25, %s3322_s22 }
 0x863   : > { %1419 = vrot.lane.b32.xlu1 %v3512_v21, %s3322_s22 }
 0x865   : > { %1349 = vrot.lane.b32.xlu0 %v3508_v9, %s3323_s23 }
 0x867   : > { %1417 = vrot.lane.b32.xlu1 %v3516_v25, %s3323_s23 }
 0x869   : > { %1415 = vrot.lane.b32.xlu0 %v3512_v21, %s3323_s23 }
 0x892   : > { %v1191_v41 = vpop.xlane.xlu1 %1190 }
 0x893   : > { %3154 = vrcp.f32 %v1191_v41 }
 0x896   : > { %v1197_v43 = vpop.xlane.xlu1 %1196 }
 0x897   : > { %v1194_v44 = vpop.xlane.xlu0 %1193  ;;  %3156 = vrcp.f32 %v1197_v43 }
 0x898   : > { %3158 = vrcp.f32 %v1194_v44 }
 0x89a   : > { %v1226_v47 = vpop.permute.xlu1 %1225 }
 0x89b   : > { %v1235_v51 = vsel %vm549_vm8, %v1226_v47, 0  ;;  %2947 = vmatprep.subr.msk.bf16.mxu0 %vm549_vm8, %v1226_v47  ;;  %v1224_v52 = vpop.permute.xlu0 %1223 }
 0x89c   : > { %2816 = vmatpush3.bf16.msra.mxu0 %v1235_v51 }
 0x89d   : > { %2817 = vmatprep.subr.bf16.mxu0 %v1224_v52 }
 0x89e   : > { %v1354_v54 = vpop.permute.xlu1 %1353 }
 0x89f   : > { %v1286_v2 = vpop.permute.xlu0 %1285  ;;  %v1365_v19 = vsel %vm328_vm6, %v1354_v54, 0 }
 0x8a0   : > { %2818 = vmatpush3.bf16.msra.mxu0 %v1224_v52  ;;  %v3155_v53 = vpop.eup %3154 }
 0x8a1   : > { %2949 = vmatprep.subr.msk.bf16.mxu0 %vm328_vm6, %v1354_v54  ;;  %v1208_v8 = vmul.f32 %v3155_v53, %v3704_v4 }
 0x8a2   : > { %v1288_v60 = vpop.permute.xlu1 %1287 }
 0x8a3   : > { %v1297_v55 = vsel %vm549_vm8, %v1288_v60, 0  ;;  %2948 = vmatprep.subr.msk.bf16.mxu1 %vm549_vm8, %v1288_v60 }
 0x8a4   : > { %v3157_v63 = vpop.eup %3156  ;;  %2824 = vmatpush3.bf16.msra.mxu1 %v1297_v55 }
 0x8a5   : > { %v3159_v3 = vpop.eup %3158  ;;  %2825 = vmatprep.subr.bf16.mxu1 %v1286_v2  ;;  %v1212_v6 = vmul.f32 %v3157_v63, %v3708_v7 }
 0x8a6   : > { %v1210_v11 = vmul.f32 %v3159_v3, %v3710_v10  ;;  %v1352_v20 = vpop.permute.xlu1 %1351 }
 0x8a7   : > { %v1220_v15 = vpack.c.bf16 %v1212_v6, %v1212_v6  ;;  %v1362_v22 = vsel %vm328_vm6, %v1352_v20, 0 }
 0x8a8   : > { %2826 = vmatpush3.bf16.msra.mxu1 %v1286_v2  ;;  %v1219_v16 = vpack.c.bf16 %v1210_v11, %v1208_v8 }
 0x8aa   : > { %2819 = vmatprep.mubr.msk.bf16.mxu0 %vm467_vm7, %v1219_v16 }
 0x8ab   : > { %2820 = vmatmul.mubr.msk.bf16.vlgmr.msra.gmra.mxu0 %vm467_vm7, %v1220_v15 }
 0x8ac   : > { %2832 = vmatpush3.bf16.xpose.msra.mxu0 %v1365_v19 }
 0x8ad   : > { %2950 = vmatprep.subr.msk.bf16.mxu0 %vm328_vm6, %v1352_v20 }
 0x8b4   : > { %2834 = vmatpush3.bf16.xpose.msra.mxu0 %v1362_v22 }
 0x8d0   : > { %v1206_v7 = vpop.xlane.xlu0 %1205 }
 0x8d1   : > { %3160 = vrcp.f32 %v1206_v7 }
 0x8d4   : > { %v1200_v4 = vpop.xlane.xlu0 %1199 }
 0x8d5   : > { %3162 = vrcp.f32 %v1200_v4 }
 0x8d7   : > { %v1203_v10 = vpop.xlane.xlu1 %1202 }
 0x8d8   : > { %v1422_v26 = vpop.permute.xlu0 %1421  ;;  %3164 = vrcp.f32 %v1203_v10 }
 0x8d9   : > { %2951 = vmatprep.subr.msk.bf16.mxu1 %vm328_vm6, %v1422_v26  ;;  %v1433_v51 = vsel %vm328_vm6, %v1422_v26, 0 }
 0x8db   : > { %v1348_v30 = vpop.permute.xlu1 %1347 }
 0x8dc   : > { %v1350_v29 = vpop.permute.xlu0 %1349  ;;  %2835 = vmatprep.mubr.msk.bf16.mxu0 %vm328_vm6, %v1348_v30 }
 0x8dd   : > { %2836 = vmatmul.mubr.msk.bf16.vlgmr.msra.gmra.mxu0 %vm328_vm6, %v1350_v29 }
 0x8de   : > { %v3161_v31 = vpop.eup %3160 }
 0x8df   : > { %v1218_v39 = vmul.f32 %v3161_v31, %v3722_v32  ;;  %v1420_v54 = vpop.permute.xlu1 %1419 }
 0x8e0   : > { %v1416_v52 = vpop.permute.xlu0 %1415  ;;  %v1430_v32 = vsel %vm328_vm6, %v1420_v54, 0 }
 0x8e1   : > { %v1222_v47 = vpack.c.bf16 %v1218_v39, %v1218_v39 }
 0x8e2   : > { %v3163_v33 = vpop.eup %3162 }
 0x8e3   : > { %v1214_v41 = vmul.f32 %v3163_v33, %v3726_v37  ;;  %v1418_v37 = vpop.permute.xlu1 %1417 }
 0x8e5   : > { %v3165_v36 = vpop.eup %3164 }
 0x8e6   : > { %v1216_v43 = vmul.f32 %v3165_v36, %v3728_v40 }
 0x8e8   : > { %v1221_v44 = vpack.c.bf16 %v1216_v43, %v1214_v41 }
 0x8ea   : > { %2827 = vmatprep.mubr.msk.bf16.mxu1 %vm467_vm7, %v1221_v44 }
 0x8eb   : > { %2828 = vmatmul.mubr.msk.bf16.vlgmr.msra.gmra.mxu1 %vm467_vm7, %v1222_v47 }
 0x8ec   : > { %2840 = vmatpush3.bf16.xpose.msra.mxu1 %v1433_v51  ;;  %2843 = vmatprep.mubr.msk.bf16.mxu1 %vm328_vm6, %v1416_v52 }
 0x8ed   : > { %2952 = vmatprep.subr.msk.bf16.mxu1 %vm328_vm6, %v1420_v54 }
 0x8f4   : > { %2842 = vmatpush3.bf16.xpose.msra.mxu1 %v1430_v32 }
 0x8fb   : > { %2844 = vmatmul.mubr.msk.bf16.vlgmr.msra.gmra.mxu1 %vm328_vm6, %v1418_v37 }
 0x96b   : > { %v3766_v40 = vpop.f32.mrf.mxu0 }
 0x96d   : > { %v3768_v60 = vpop.f32.mrf.mxu0 }
 0x96f   : > { %v2822_v53 = vpop.f32.mrf.mxu0 }
 0x971   : > { %v3770_v55 = vpop.f32.mrf.mxu0 }
 0x972   : > { %v3040_v63 = vpack.i.bf16 %v3770_v55, %v3768_v60 }
 0x99d   : > { %v2837_v2 = vpop.f32.mrf.mxu0 }
 0x99e   : > { %v1485_v6 = vmul.f32 0.35355338, %v2837_v2 }
 0x99f   : > { %v1401_v3 = vpop.f32.mrf.mxu0 }
 0x9a0   : > { %v1483_v8 = vmul.f32 0.35355338, %v1401_v3  ;;  %v1491_v19 = vadd.f32 %v1485_v6, %v3401_v13 }
 0x9a1   : > { %v2838_v11 = vpop.f32.mrf.mxu0 }
 0x9a2   : > { %v1489_v15 = vadd.f32 %v1483_v8, %v3401_v13  ;;  %v1501_v4 = vsel %vm467_vm7, %v1491_v19, -inf }
 0x9a3   : > { %v1404_v16 = vpop.f32.mrf.mxu0 }
 0x9a4   : > { %v1484_v20 = vmul.f32 0.35355338, %v1404_v16  ;;  %v1495_v22 = vsel %vm467_vm7, %v1489_v15, -inf }
 0x9a5   : > { %1496 = vmax.xlane.f32.xlu0 %v1495_v22 }
 0x9a6   : > { %v1490_v7 = vadd.f32 %v1484_v20, %v3401_v13 }
 0x9a8   : > { %v1498_v10 = vsel %vm467_vm7, %v1490_v7, -inf }
 0x9a9   : > { %1502 = vmax.xlane.f32.xlu0 %v1501_v4  ;;  %1499 = vmax.xlane.f32.xlu1 %v1498_v10 }
 0x9ab   : > { %v3780_v26 = vpop.f32.mrf.mxu1 }
 0x9ad   : > { %v3782_v30 = vpop.f32.mrf.mxu1 }
 0x9af   : > { %v2830_v29 = vpop.f32.mrf.mxu1 }
 0x9b1   : > { %v3784_v31 = vpop.f32.mrf.mxu1 }
 0x9b2   : > { %v3070_v33 = vpack.i.bf16 %v3780_v26, %v3784_v31 }
 0x9bb   : > { %v2845_v36 = vpop.f32.mrf.mxu1 }
 0x9bc   : > { %v1488_v41 = vmul.f32 0.35355338, %v2845_v36 }
 0x9bd   : > { %v1469_v39 = vpop.f32.mrf.mxu1 }
 0x9be   : > { %v1486_v43 = vmul.f32 0.35355338, %v1469_v39  ;;  %v1494_v52 = vadd.f32 %v1488_v41, %v3401_v13 }
 0x9bf   : > { %v2846_v44 = vpop.f32.mrf.mxu1 }
 0x9c0   : > { %v1492_v47 = vadd.f32 %v1486_v43, %v3401_v13  ;;  %v1510_v53 = vsel %vm467_vm7, %v1494_v52, -inf }
 0x9c1   : > { %v1472_v51 = vpop.f32.mrf.mxu1 }
 0x9c2   : > { %v1487_v54 = vmul.f32 0.35355338, %v1472_v51  ;;  %v1504_v32 = vsel %vm467_vm7, %v1492_v47, -inf }
 0x9c3   : > { %1505 = vmax.xlane.f32.xlu0 %v1504_v32 }
 0x9c4   : > { %v1493_v37 = vadd.f32 %v1487_v54, %v3401_v13  ;;  %v3229_v13 = vld [vmem:[%s4141_s6 + $0x8] sm:$0xff] (%p180_p0)  }
 0x9c6   : > { %v1507_v2 = vsel %vm467_vm7, %v1493_v37, -inf }
 0x9c7   : > { %1511 = vmax.xlane.f32.xlu0 %v1510_v53  ;;  %1508 = vmax.xlane.f32.xlu1 %v1507_v2 }
 0xa2e   : > { %v1497_v3 = vpop.xlane.xlu0 %1496 }
 0xa2f   : > { %v1513_v6 = vsub.f32 %v1489_v15, %v1497_v3 }
 0xa31   : > { %v1519_v8 = vmul.f32 1.442695, %v1513_v6 }
 0xa32   : > { %v1503_v11 = vpop.xlane.xlu0 %1502  ;;  %v1500_v16 = vpop.xlane.xlu1 %1499 }
 0xa33   : > { %3166 = vpow2.f32 %v1519_v8  ;;  %v1515_v20 = vsub.f32 %v1491_v19, %v1503_v11  ;;  %v1514_v22 = vsub.f32 %v1490_v7, %v1500_v16  ;;  %v3226_v11 = vld [vmem:[%s3470_s28 + $0x10] ss:$8 sps:$4 sm:$0xff]   ;;  %v3055_v16 = vpack.i.bf16 %v3782_v30, %v3766_v40 }
 0xa35   : > { %v1523_v4 = vmul.f32 1.442695, %v1515_v20  ;;  %v1521_v10 = vmul.f32 1.442695, %v1514_v22 }
 0xa37   : > { %3168 = vpow2.f32 %v1523_v4 }
 0xa38   : > { %3170 = vpow2.f32 %v1521_v10 }
 0xa40   : > { %v3167_v29 = vpop.eup %3166 }
 0xa41   : > { %v1531_v36 = vsel %vm467_vm7, %v3167_v29, 0.0 }
 0xa42   : > { %1532 = vadd.xlane.f32.xlu1 %v1531_v36 }
 0xa44   : > { %v3795_v39 = vpop.eup %3168 }
 0xa45   : > { %v3171_v41 = vpop.eup %3170  ;;  %v1537_v15 = vsel %vm467_vm7, %v3795_v39, 0.0 }
 0xa46   : > { %1538 = vadd.xlane.f32.xlu1 %v1537_v15  ;;  %v1534_v43 = vsel %vm467_vm7, %v3171_v41, 0.0 }
 0xa47   : > { %1535 = vadd.xlane.f32.xlu0 %v1534_v43 }
 0xa4c   : > { %v1506_v19 = vpop.xlane.xlu0 %1505 }
 0xa4d   : > { %v1516_v7 = vsub.f32 %v1492_v47, %v1506_v19 }
 0xa4f   : > { %v1525_v54 = vmul.f32 1.442695, %v1516_v7 }
 0xa50   : > { %v1512_v44 = vpop.xlane.xlu0 %1511  ;;  %v1509_v2 = vpop.xlane.xlu1 %1508 }
 0xa51   : > { %v1518_v51 = vsub.f32 %v1494_v52, %v1512_v44  ;;  %v1517_v47 = vsub.f32 %v1493_v37, %v1509_v2  ;;  %v3227_v37 = vld [vmem:[%s3470_s28] ss:$8 sps:$4 sm:$0xff]   ;;  %v3082_v2 = vld [vmem:[%s3470_s28 + $0x14] ss:$8 sps:$4 sm:$0xff]  }
 0xa53   : > { %v1529_v32 = vmul.f32 1.442695, %v1518_v51  ;;  %v1527_v8 = vmul.f32 1.442695, %v1517_v47 }
 0xa55   : > { %3172 = vpow2.f32 %v1529_v32 }
 0xa56   : > { %3174 = vpow2.f32 %v1525_v54 }
 0xa57   : > { %1567 = vrot.lane.b32.xlu1 %v3508_v9, %s3324_s0  ;;  %3176 = vpow2.f32 %v1527_v8 }
 0xa5b   : > { %1629 = vrot.lane.b32.xlu1 %v3516_v25, %s3324_s0 }
 0xa62   : > { %v3802_v53 = vpop.eup %3172 }
 0xa63   : > { %v1546_v3 = vsel %vm467_vm7, %v3802_v53, 0.0  ;;  %v3806_v6 = vpop.eup %3174 }
 0xa64   : > { %1547 = vadd.xlane.f32.xlu0 %v1546_v3  ;;  %v1540_v52 = vsel %vm467_vm7, %v3806_v6, 0.0  ;;  %v3810_v9 = vpop.eup %3176 }
 0xa65   : > { %v1543_v25 = vsel %vm467_vm7, %v3810_v9, 0.0 }
 0xa68   : > { %1541 = vadd.xlane.f32.xlu0 %v1540_v52  ;;  %v3085_v52 = vld [vmem:[%s3470_s28 + $0x4] ss:$8 sps:$4 sm:$0xff]  }
 0xa7e   : > { %1565 = vrot.lane.b32.xlu0 %v3504_v5, %s3324_s0 }
 0xa7f   : > { %1544 = vadd.xlane.f32.xlu1 %v1543_v25 }
 0xa82   : > { %1803 = vrot.lane.b32.xlu0 %v3226_v11, %s3325_s24  ;;  %v3050_v11 = vpack.i.bf16 %v3692_v24, %v3676_v56 }
 0xa86   : > { %3041 = vrot.lane.b32.xlu0 %v3040_v63, %s3326_s25 }
 0xa8a   : > { %1801 = vrot.lane.b32.xlu0 %v3227_v37, %s3325_s24 }
 0xa8e   : > { %3056 = vrot.lane.b32.xlu0 %v3055_v16, %s3326_s25 }
 0xa90   : > { %1627 = vrot.lane.b32.xlu1 %v3512_v21, %s3324_s0 }
 0xa92   : > { %3061 = vrot.lane.b32.xlu0 %v3060_v28, %s3327_s26 }
 0xa94   : > { %3036 = vrot.lane.b32.xlu1 %v3035_v1, %s3327_s26 }
 0xacb   : > { %v1533_v5 = vpop.xlane.xlu1 %1532 }
 0xacc   : > { %3178 = vrcp.f32 %v1533_v5 }
 0xacf   : > { %v1539_v60 = vpop.xlane.xlu1 %1538 }
 0xad0   : > { %v1536_v55 = vpop.xlane.xlu0 %1535 }
 0xad1   : > { %3180 = vrcp.f32 %v1536_v55 }
 0xad2   : > { %3182 = vrcp.f32 %v1539_v60 }
 0xad3   : > { %v1568_v40 = vpop.permute.xlu1 %1567 }
 0xad4   : > { %v1577_v63 = vsel %vm549_vm8, %v1568_v40, 0  ;;  %2953 = vmatprep.subr.msk.bf16.mxu0 %vm549_vm8, %v1568_v40 }
 0xad5   : > { %2848 = vmatpush3.bf16.msra.mxu0 %v1577_v63 }
 0xad7   : > { %v1630_v21 = vpop.permute.xlu1 %1629 }
 0xad8   : > { %v1639_v23 = vsel %vm549_vm8, %v1630_v21, 0  ;;  %2954 = vmatprep.subr.msk.bf16.mxu1 %vm549_vm8, %v1630_v21 }
 0xad9   : > { %2856 = vmatpush3.bf16.msra.mxu1 %v1639_v23  ;;  %v3179_v27 = vpop.eup %3178 }
 0xada   : > { %v1550_v0 = vmul.f32 %v3179_v27, %v3167_v29 }
 0xade   : > { %v3181_v62 = vpop.eup %3180 }
 0xadf   : > { %v1552_v1 = vmul.f32 %v3181_v62, %v3171_v41  ;;  %v3183_v20 = vpop.eup %3182 }
 0xae0   : > { %v1554_v4 = vmul.f32 %v3183_v20, %v3795_v39 }
 0xae1   : > { %v1561_v28 = vpack.c.bf16 %v1552_v1, %v1550_v0 }
 0xae2   : > { %v1562_v36 = vpack.c.bf16 %v1554_v4, %v1554_v4 }
 0xae3   : > { %2851 = vmatprep.mubr.msk.bf16.mxu0 %vm467_vm7, %v1561_v28 }
 0xaed   : > { %v1548_v30 = vpop.xlane.xlu0 %1547 }
 0xaee   : > { %3184 = vrcp.f32 %v1548_v30 }
 0xaf1   : > { %v1542_v22 = vpop.xlane.xlu0 %1541 }
 0xaf2   : > { %3186 = vrcp.f32 %v1542_v22 }
 0xaf5   : > { %v1566_v10 = vpop.permute.xlu0 %1565 }
 0xaf6   : > { %2849 = vmatprep.subr.bf16.mxu0 %v1566_v10 }
 0xaf7   : > { %2850 = vmatpush3.bf16.msra.mxu0 %v1566_v10 }
 0xaf8   : > { %2863 = vmatprep.subr.bf16.mxu0 %v3312_v50 }
 0xaf9   : > { %v1804_v15 = vpop.permute.xlu0 %1803 }
 0xafa   : > { %2852 = vmatmul.mubr.msk.bf16.vlgmr.msra.gmra.mxu0 %vm467_vm7, %v1562_v36 }
 0xafb   : > { %2864 = vmatpush3.bf16.msra.mxu0 %v1804_v15  ;;  %2867 = vmatprep.mubr.msk.bf16.mxu0 %vm3313_vm4, %v3312_v50  ;;  %v3185_v19 = vpop.eup %3184 }
 0xafc   : > { %2865 = vmatprep.subr.bf16.mxu0 %v3312_v50  ;;  %v1560_v51 = vmul.f32 %v3185_v19, %v3802_v53 }
 0xafd   : > { %v3042_v29 = vpop.permute.xlu0 %3041 }
 0xafe   : > { %v1564_v47 = vpack.c.bf16 %v1560_v51, %v1560_v51  ;;  %v3044_v27 = vunpack.i.h.bf16 %v3042_v29  ;;  %v3043_v62 = vunpack.i.l.bf16 %v3042_v29 }
 0xaff   : > { %v3187_v7 = vpop.eup %3186 }
 0xb00   : > { %v1556_v54 = vmul.f32 %v3187_v7, %v3806_v6 }
 0xb01   : > { %v1802_v41 = vpop.permute.xlu0 %1801 }
 0xb02   : > { %2866 = vmatpush3.bf16.msra.mxu0 %v1802_v41 }
 0xb03   : > { %2895 = vmatprep.subr.bf16.mxu0 %v3312_v50 }
 0xb08   : > { %v1545_v39 = vpop.xlane.xlu1 %1544 }
 0xb09   : > { %3188 = vrcp.f32 %v1545_v39 }
 0xb0c   : > { %v1628_v43 = vpop.permute.xlu1 %1627 }
 0xb0d   : > { %2857 = vmatprep.subr.bf16.mxu1 %v1628_v43 }
 0xb0e   : > { %2858 = vmatpush3.bf16.msra.mxu1 %v1628_v43 }
 0xb0f   : > { %2879 = vmatprep.subr.bf16.mxu1 %v3312_v50 }
 0xb10   : > { %v3037_v63 = vpop.permute.xlu1 %3036 }
 0xb11   : > { %v3039_v21 = vunpack.i.h.bf16 %v3037_v63  ;;  %v3038_v23 = vunpack.i.l.bf16 %v3037_v63  ;;  %v3898_v63 = vld [vmem:[%s3500_s14] sm:$0xff] }
 0xb13   : > { %v1762_v56 = vsel %vm328_vm6, %v3600_v57, %v3039_v21  ;;  %v1761_v24 = vsel %vm328_vm6, %v3592_v35, %v3038_v23  ;;  %v3057_v57 = vpop.permute.xlu0 %3056 }
 0xb14   : > { %v1768_v30 = vsel %vm1767_vm9, %v1761_v24, %v3043_v62  ;;  %v1769_v26 = vsel %vm1767_vm9, %v1762_v56, %v3044_v27  ;;  %v3059_v29 = vunpack.i.h.bf16 %v3057_v57  ;;  %v3058_v41 = vunpack.i.l.bf16 %v3057_v57 }
 0xb16   : > { %v3189_v44 = vpop.eup %3188 }
 0xb17   : > { %v1558_v32 = vmul.f32 %v3189_v44, %v3810_v9  ;;  %v3062_v10 = vpop.permute.xlu0 %3061 }
 0xb18   : > { %v3064_v7 = vunpack.i.h.bf16 %v3062_v10  ;;  %v3063_v44 = vunpack.i.l.bf16 %v3062_v10 }
 0xb19   : > { %v1563_v3 = vpack.c.bf16 %v1558_v32, %v1556_v54 }
 0xb1b   : > { %2859 = vmatprep.mubr.msk.bf16.mxu1 %vm467_vm7, %v1563_v3 }
 0xb1c   : > { %2860 = vmatmul.mubr.msk.bf16.vlgmr.msra.gmra.mxu1 %vm467_vm7, %v1564_v47 }
 0xb1d   : > { %2880 = vmatpush3.bf16.msra.mxu1 %v3082_v2  ;;  %2883 = vmatprep.mubr.msk.bf16.mxu1 %vm3313_vm4, %v3312_v50 }
 0xb1e   : > { %2881 = vmatprep.subr.bf16.mxu1 %v3312_v50 }
 0xb21   : > { %2882 = vmatpush3.bf16.msra.mxu1 %v3085_v52 }
 0xbba   : > { %v2853_v53 = vpop.f32.mrf.mxu0 }
 0xbbc   : > { %v1613_v8 = vpop.f32.mrf.mxu0 }
 0xbbe   : > { %v2854_v6 = vpop.f32.mrf.mxu0 }
 0xbbf   : > { %v1766_v6 = vsel %vm328_vm6, %v3602_v58, %v3064_v7 }
 0xbc0   : > { %v1616_v25 = vpop.f32.mrf.mxu0 }
 0xbc1   : > { %v3045_v9 = vpack.i.bf16 %v1616_v25, %v1613_v8  ;;  %v1765_v25 = vsel %vm328_vm6, %v3606_v61, %v3063_v44  ;;  %v1786_v61 = vsub.s32 1, %v3403_v14 }
 0xbc3   : > { %3046 = vrot.lane.b32.xlu1 %v3045_v9, %s3328_s27  ;;  %v1787_v21 = vrot.slane %v3898_v63, %v1786_v61 }
 0xbc7   : > { %3051 = vrot.lane.b32.xlu1 %v3050_v11, %s3327_s26 }
 0xbdc   : > { %v2861_v37 = vpop.f32.mrf.mxu1 }
 0xbde   : > { %v1675_v16 = vpop.f32.mrf.mxu1 }
 0xbdf   : > { %v3065_v5 = vpack.i.bf16 %v1675_v16, %v2853_v53 }
 0xbe0   : > { %v2862_v60 = vpop.f32.mrf.mxu1 }
 0xbe1   : > { %3066 = vrot.lane.b32.xlu1 %v3065_v5, %s3328_s27 }
 0xbe2   : > { %v1678_v55 = vpop.f32.mrf.mxu1 }
 0xbe3   : > { %v3075_v40 = vpack.i.bf16 %v2861_v37, %v1678_v55 }
 0xbe5   : > { %3071 = vrot.lane.b32.xlu1 %v3070_v33, %s3326_s25  ;;  %3076 = vrot.lane.b32.xlu0 %v3075_v40, %s3328_s27 }
 0xc35   : > { %v3047_v0 = vpop.permute.xlu1 %3046 }
 0xc36   : > { %v3049_v1 = vunpack.i.h.bf16 %v3047_v0  ;;  %v3048_v28 = vunpack.i.l.bf16 %v3047_v0 }
 0xc38   : > { %v1774_v31 = vsel %vm467_vm7, %v1768_v30, %v3048_v28  ;;  %v1775_v33 = vsel %vm467_vm7, %v1769_v26, %v3049_v1 }
 0xc39   : > { %v1780_v20 = vpack.c.bf16 %v1775_v33, %v1774_v31  ;;  %v3052_v35 = vpop.permute.xlu1 %3051 }
 0xc3a   : > { %v3054_v22 = vunpack.i.h.bf16 %v3052_v35  ;;  %v3053_v4 = vunpack.i.l.bf16 %v3052_v35 }
 0xc3b   : > { %2868 = vmatmul.mubr.msk.bf16.vlgmr.msra.gmra.mxu0 %vm251_vm5, %v1780_v20 }
 0xc3c   : > { %2871 = vmatprep.mubr.msk.bf16.mxu0 %vm3313_vm4, %v3312_v50  ;;  %v1764_v36 = vsel %vm328_vm6, %v3604_v59, %v3054_v22  ;;  %v1763_v15 = vsel %vm328_vm6, %v3590_v34, %v3053_v4 }
 0xc3d   : > { %v1770_v51 = vsel %vm1767_vm9, %v1763_v15, %v3058_v41  ;;  %v1771_v54 = vsel %vm1767_vm9, %v1764_v36, %v3059_v29 }
 0xc53   : > { %v3067_v39 = vpop.permute.xlu1 %3066 }
 0xc54   : > { %v3069_v43 = vunpack.i.h.bf16 %v3067_v39  ;;  %v3068_v19 = vunpack.i.l.bf16 %v3067_v39 }
 0xc56   : > { %v1776_v32 = vsel %vm467_vm7, %v1770_v51, %v3068_v19  ;;  %v1777_v2 = vsel %vm467_vm7, %v1771_v54, %v3069_v43 }
 0xc57   : > { %v2605_v3 = vpack.c.bf16 %v1777_v2, %v1776_v32  ;;  %v3077_v59 = vpop.permute.xlu0 %3076  ;;  %v3072_v47 = vpop.permute.xlu1 %3071 }
 0xc58   : > { %v3079_v52 = vunpack.i.h.bf16 %v3077_v59  ;;  %v3078_v34 = vunpack.i.l.bf16 %v3077_v59  ;;  %v3074_v53 = vunpack.i.h.bf16 %v3072_v47  ;;  %v3073_v8 = vunpack.i.l.bf16 %v3072_v47 }
 0xc59   : > { %2872 = vmatmul.mubr.msk.bf16.gmra.mxu0 %vm251_vm5, %v2605_v3 }
 0xc5a   : > { %v1773_v9 = vsel %vm1767_vm9, %v1766_v6, %v3074_v53  ;;  %v1772_v11 = vsel %vm1767_vm9, %v1765_v25, %v3073_v8  ;;  %2875 = vmatprep.mubr.msk.bf16.mxu0 %vm3313_vm4, %v3312_v50  ;;  %v3086_v8 = vld [vmem:[%s3477_s10 + $0x38] sm:$0xff]  }
 0xc5b   : > { %v1779_v37 = vsel %vm467_vm7, %v1773_v9, %v3079_v52  ;;  %v1778_v16 = vsel %vm467_vm7, %v1772_v11, %v3078_v34  ;;  %2896 = vmatpush3.bf16.msra.mxu0 %v3086_v8 }
 0xc5c   : > { %v1783_v5 = vpack.c.bf16 %v1779_v37, %v1779_v37  ;;  %v1782_v60 = vpack.c.bf16 %v1778_v16, %v1777_v2  ;;  %2897 = vmatprep.subr.bf16.mxu0 %v3312_v50 }
 0xc5e   : > { %v1797_v58 = vunpack.c.l.b16 %v1783_v5  ;;  %v1796_v55 = vunpack.c.h.b16 %v1782_v60 }
 0xc60   : > { %v1800_v40 = vpack.c.b16 %v1797_v58, %v1796_v55 }
 0xc62   : > { %2876 = vmatmul.mubr.msk.bf16.gmra.mxu0 %vm251_vm5, %v1800_v40 }
 0xc63   : > { %2911 = vmatprep.mubr.msk.bf16.mxu0 %vm3313_vm4, %v3312_v50 }
 0xcfb   : > { %v1850_v23 = vpop.f32.mrf.mxu0 }
 0xcfc   : > { %v1851_v56 = vadd.f32 %v1850_v23, %v1787_v21  ;;  %v3954_v23 = vrot.slane %v3898_v63, %v54_v17  ;;  %v3230_v17 = vld [vmem:[%s4141_s6] sm:$0xff] (%p180_p0)  }
 0xcfd   : > { %v2869_v24 = vpop.f32.mrf.mxu0 }
 0xcfe   : > { %v3902_v27 = vadd.f32 %v3305_v42, %v1851_v56  ;;  %v1982_v56 = vsub.s32 3, %v3403_v14 }
 0xcff   : > { %v1853_v62 = vpop.f32.mrf.mxu0 }
 0xd00   : > { %v1854_v0 = vadd.f32 %v1853_v62, %v1787_v21  ;;  %v1879_v1 = vsel %vm251_vm5, %v3902_v27, 0.0  ;;  %v1904_v42 = vmul.f32 %v3902_v27, %v3902_v27 }
 0xd01   : > { %1880 = vadd.xlane.f32.xlu1 %v1879_v1  ;;  %v2870_v28 = vpop.f32.mrf.mxu0 }
 0xd02   : > { %v3907_v30 = vadd.f32 %v3301_v48, %v1854_v0  ;;  %v1910_v20 = vsel %vm251_vm5, %v1904_v42, 0.0 }
 0xd04   : > { %v1882_v26 = vsel %vm251_vm5, %v3907_v30, 0.0  ;;  %v1905_v31 = vmul.f32 %v3907_v30, %v3907_v30 }
 0xd05   : > { %1883 = vadd.xlane.f32.xlu0 %v1882_v26  ;;  %v3962_v26 = vrot.slane %v3898_v63, %v1982_v56 }
 0xd06   : > { %v1913_v33 = vsel %vm251_vm5, %v1905_v31, 0.0 }
 0xd07   : > { %1914 = vadd.xlane.f32.xlu1 %v1913_v33 }
 0xd09   : > { %1911 = vadd.xlane.f32.xlu0 %v1910_v20 }
 0xd19   : > { %v1858_v35 = vpop.f32.mrf.mxu0 }
 0xd1a   : > { %v1859_v57 = vadd.f32 %v1858_v35, %v1787_v21 }
 0xd1b   : > { %v2873_v48 = vpop.f32.mrf.mxu0 }
 0xd1c   : > { %v3918_v22 = vadd.f32 %v3297_v49, %v1859_v57 }
 0xd1d   : > { %v1861_v4 = vpop.f32.mrf.mxu0 }
 0xd1e   : > { %v1862_v10 = vadd.f32 %v1861_v4, %v1787_v21  ;;  %v1885_v36 = vsel %vm251_vm5, %v3918_v22, 0.0  ;;  %v1906_v15 = vmul.f32 %v3918_v22, %v3918_v22 }
 0xd1f   : > { %1886 = vadd.xlane.f32.xlu0 %v1885_v36  ;;  %v2874_v29 = vpop.f32.mrf.mxu0 }
 0xd20   : > { %v3925_v41 = vadd.f32 %v3293_v38, %v1862_v10  ;;  %v1916_v43 = vsel %vm251_vm5, %v1906_v15, 0.0 }
 0xd22   : > { %v1866_v39 = vpop.f32.mrf.mxu0  ;;  %v1888_v49 = vsel %vm251_vm5, %v3925_v41, 0.0  ;;  %v1907_v19 = vmul.f32 %v3925_v41, %v3925_v41 }
 0xd23   : > { %v1867_v7 = vadd.f32 %v1866_v39, %v1787_v21  ;;  %1917 = vadd.xlane.f32.xlu0 %v1916_v43  ;;  %1889 = vadd.xlane.f32.xlu1 %v1888_v49 }
 0xd24   : > { %v2877_v44 = vpop.f32.mrf.mxu0  ;;  %v1919_v38 = vsel %vm251_vm5, %v1907_v19, 0.0 }
 0xd25   : > { %v3933_v51 = vadd.f32 %v3289_v45, %v1867_v7 }
 0xd26   : > { %v1869_v54 = vpop.f32.mrf.mxu0 }
 0xd27   : > { %v1870_v32 = vadd.f32 %v1869_v54, %v1787_v21  ;;  %1920 = vadd.xlane.f32.xlu1 %v1919_v38  ;;  %v1891_v2 = vsel %vm251_vm5, %v3933_v51, 0.0  ;;  %v1908_v3 = vmul.f32 %v3933_v51, %v3933_v51 }
 0xd28   : > { %1892 = vadd.xlane.f32.xlu0 %v1891_v2  ;;  %v2878_v59 = vpop.f32.mrf.mxu0 }
 0xd29   : > { %v3941_v47 = vadd.f32 %v3285_v46, %v1870_v32  ;;  %v1922_v45 = vsel %vm251_vm5, %v1908_v3, 0.0 }
 0xd2b   : > { %v1894_v52 = vsel %vm251_vm5, %v3941_v47, 0.0  ;;  %v1909_v34 = vmul.f32 %v3941_v47, %v3941_v47 }
 0xd2c   : > { %1923 = vadd.xlane.f32.xlu0 %v1922_v45  ;;  %1895 = vadd.xlane.f32.xlu1 %v1894_v52 }
 0xd2d   : > { %v1925_v53 = vsel %vm251_vm5, %v1909_v34, 0.0 }
 0xd30   : > { %1926 = vadd.xlane.f32.xlu1 %v1925_v53 }
 0xd8a   : > { %v1881_v6 = vpop.xlane.xlu1 %1880 }
 0xd8b   : > { %v1898_v25 = vmul.f32 0.03125, %v1881_v6 }
 0xd8d   : > { %v1934_v60 = vmul.f32 %v1898_v25, %v1898_v25  ;;  %v1946_v0 = vsub.f32 %v3902_v27, %v1898_v25 }
 0xd8e   : > { %v1884_v46 = vpop.xlane.xlu0 %1883 }
 0xd8f   : > { %v1899_v9 = vmul.f32 0.03125, %v1884_v46 }
 0xd90   : > { %v1915_v11 = vpop.xlane.xlu1 %1914 }
 0xd91   : > { %v1935_v37 = vmul.f32 %v1899_v9, %v1899_v9  ;;  %v1929_v16 = vmul.f32 0.03125, %v1915_v11  ;;  %v1947_v24 = vsub.f32 %v3907_v30, %v1899_v9 }
 0xd92   : > { %v1912_v5 = vpop.xlane.xlu0 %1911 }
 0xd93   : > { %v1941_v58 = vsub.f32 %v1929_v16, %v1935_v37  ;;  %v1928_v55 = vmul.f32 0.03125, %v1912_v5 }
 0xd95   : > { %v1953_v40 = vadd.f32 1e-05, %v1941_v58  ;;  %v1940_v61 = vsub.f32 %v1928_v55, %v1934_v60 }
 0xd97   : > { %3190 = vrsqrt.f32 %v1953_v40  ;;  %v1952_v21 = vadd.f32 1e-05, %v1940_v61 }
 0xd99   : > { %3192 = vrsqrt.f32 %v1952_v21 }
 0xda4   : > { %v3191_v62 = vpop.eup %3190 }
 0xda5   : > { %v1965_v1 = vmul.f32 %v3191_v62, %v1947_v24 }
 0xda6   : > { %v3193_v28 = vpop.eup %3192 }
 0xda7   : > { %v1964_v31 = vmul.f32 %v3193_v28, %v1946_v0  ;;  %v1975_v42 = vmul.f32 %v3954_v23, %v1965_v1 }
 0xda8   : > { %v1887_v33 = vpop.xlane.xlu0 %1886 }
 0xda9   : > { %v1900_v20 = vmul.f32 0.03125, %v1887_v33  ;;  %v1974_v35 = vmul.f32 %v3954_v23, %v1964_v31  ;;  %v3970_v30 = vadd.f32 %v3962_v26, %v1975_v42 }
 0xdab   : > { %v3967_v57 = vadd.f32 %v3962_v26, %v1974_v35  ;;  %v1936_v4 = vmul.f32 %v1900_v20, %v1900_v20  ;;  %v1948_v9 = vsub.f32 %v3918_v22, %v1900_v20 }
 0xdac   : > { %v1918_v27 = vpop.xlane.xlu0 %1917  ;;  %v1890_v48 = vpop.xlane.xlu1 %1889 }
 0xdad   : > { %v1930_v10 = vmul.f32 0.03125, %v1918_v27  ;;  %v1901_v36 = vmul.f32 0.03125, %v1890_v48  ;;  %v1990_v15 = vpack.c.bf16 %v3970_v30, %v3967_v57  ;;  %v3087_v48 = vld [vmem:[%s3477_s10 + $0x30] sm:$0xff]  }
 0xdae   : > { %2898 = vmatpush3.bf16.msra.mxu0 %v3087_v48 }
 0xdaf   : > { %v1942_v29 = vsub.f32 %v1930_v10, %v1936_v4  ;;  %2884 = vmatmul.mubr.msk.bf16.vlgmr.msra.gmra.mxu1 %vm251_vm5, %v1990_v15  ;;  %v1937_v49 = vmul.f32 %v1901_v36, %v1901_v36  ;;  %v1949_v16 = vsub.f32 %v3925_v41, %v1901_v36  ;;  %2899 = vmatprep.subr.bf16.mxu0 %v3312_v50  ;;  %v3090_v4 = vld [vmem:[%s3477_s10 + $0x18] sm:$0xff]   ;;  %v3091_v10 = vld [vmem:[%s3477_s10 + $0x10] sm:$0xff]   ;;  %v3092_v36 = vld [vmem:[%s3477_s10 + $0x8] sm:$0xff]  }
 0xdb0   : > { %v1921_v39 = vpop.xlane.xlu1 %1920  ;;  %2887 = vmatprep.mubr.msk.bf16.mxu1 %vm3313_vm4, %v3312_v50  ;;  %v3093_v15 = vld [vmem:[%s3477_s10] sm:$0xff]  }
 0xdb1   : > { %v1954_v43 = vadd.f32 1e-05, %v1942_v29  ;;  %v1931_v19 = vmul.f32 0.03125, %v1921_v39  ;;  %v1893_v7 = vpop.xlane.xlu0 %1892  ;;  %v1996_v29 = vsub.s32 4, %v3403_v14 }
 0xdb2   : > { %v1902_v44 = vmul.f32 0.03125, %v1893_v7 }
 0xdb3   : > { %3194 = vrsqrt.f32 %v1954_v43  ;;  %v1943_v54 = vsub.f32 %v1931_v19, %v1937_v49  ;;  %v1997_v39 = vrot.slane %v3898_v63, %v1996_v29 }
 0xdb4   : > { %v1938_v3 = vmul.f32 %v1902_v44, %v1902_v44  ;;  %v1950_v40 = vsub.f32 %v3933_v51, %v1902_v44 }
 0xdb5   : > { %v1955_v38 = vadd.f32 1e-05, %v1943_v54  ;;  %v1924_v32 = vpop.xlane.xlu0 %1923  ;;  %v1896_v2 = vpop.xlane.xlu1 %1895 }
 0xdb6   : > { %v1932_v59 = vmul.f32 0.03125, %v1924_v32  ;;  %v1903_v45 = vmul.f32 0.03125, %v1896_v2 }
 0xdb7   : > { %3196 = vrsqrt.f32 %v1955_v38 }
 0xdb8   : > { %v1944_v52 = vsub.f32 %v1932_v59, %v1938_v3  ;;  %v1939_v8 = vmul.f32 %v1903_v45, %v1903_v45  ;;  %v1951_v41 = vsub.f32 %v3941_v47, %v1903_v45 }
 0xdb9   : > { %v1927_v34 = vpop.xlane.xlu1 %1926 }
 0xdba   : > { %v1956_v53 = vadd.f32 1e-05, %v1944_v52  ;;  %v1933_v6 = vmul.f32 0.03125, %v1927_v34 }
 0xdbc   : > { %3198 = vrsqrt.f32 %v1956_v53  ;;  %v1945_v46 = vsub.f32 %v1933_v6, %v1939_v8 }
 0xdbe   : > { %v1957_v25 = vadd.f32 1e-05, %v1945_v46 }
 0xdc0   : > { %v3195_v11 = vpop.eup %3194  ;;  %3200 = vrsqrt.f32 %v1957_v25 }
 0xdc1   : > { %v1966_v37 = vmul.f32 %v3195_v11, %v1948_v9 }
 0xdc3   : > { %v1976_v58 = vmul.f32 %v3954_v23, %v1966_v37 }
 0xdc4   : > { %v3197_v5 = vpop.eup %3196 }
 0xdc5   : > { %v1967_v60 = vmul.f32 %v3197_v5, %v1949_v16  ;;  %v3983_v21 = vadd.f32 %v3962_v26, %v1976_v58 }
 0xdc7   : > { %v1977_v55 = vmul.f32 %v3954_v23, %v1967_v60 }
 0xdc9   : > { %v3199_v61 = vpop.eup %3198  ;;  %v3986_v24 = vadd.f32 %v3962_v26, %v1977_v55 }
 0xdca   : > { %v1968_v22 = vmul.f32 %v3199_v61, %v1950_v40 }
 0xdcb   : > { %v2606_v62 = vpack.c.bf16 %v3986_v24, %v3983_v21 }
 0xdcc   : > { %v1978_v0 = vmul.f32 %v3954_v23, %v1968_v22 }
 0xdcd   : > { %v3201_v1 = vpop.eup %3200  ;;  %2888 = vmatmul.mubr.msk.bf16.gmra.mxu1 %vm251_vm5, %v2606_v62 }
 0xdce   : > { %2891 = vmatprep.mubr.msk.bf16.mxu1 %vm3313_vm4, %v3312_v50  ;;  %v1969_v51 = vmul.f32 %v3201_v1, %v1951_v41  ;;  %v3996_v28 = vadd.f32 %v3962_v26, %v1978_v0 }
 0xdd0   : > { %v1979_v31 = vmul.f32 %v3954_v23, %v1969_v51  ;;  %v1992_v47 = vpack.c.bf16 %v3996_v28, %v3986_v24  ;;  %v3088_v23 = vld [vmem:[%s3477_s10 + $0x28] sm:$0xff]  }
 0xdd1   : > { %2900 = vmatpush3.bf16.msra.mxu0 %v3088_v23 }
 0xdd2   : > { %v4000_v42 = vadd.f32 %v3962_v26, %v1979_v31  ;;  %v2006_v20 = vunpack.c.h.b16 %v1992_v47  ;;  %2901 = vmatprep.subr.bf16.mxu0 %v3312_v50  ;;  %v3089_v26 = vld [vmem:[%s3477_s10 + $0x20] sm:$0xff]  }
 0xdd4   : > { %v1993_v33 = vpack.c.bf16 %v4000_v42, %v4000_v42 }
 0xdd5   : > { %2902 = vmatpush3.bf16.msra.mxu0 %v3089_v26 }
 0xdd6   : > { %v2007_v35 = vunpack.c.l.b16 %v1993_v33  ;;  %2903 = vmatprep.subr.bf16.mxu0 %v3312_v50 }
 0xdd8   : > { %v2010_v27 = vpack.c.b16 %v2007_v35, %v2006_v20 }
 0xdd9   : > { %2904 = vmatpush3.bf16.msra.mxu0 %v3090_v4 }
 0xdda   : > { %2892 = vmatmul.mubr.msk.bf16.gmra.mxu1 %vm251_vm5, %v2010_v27  ;;  %2905 = vmatprep.subr.bf16.mxu0 %v3312_v50 }
 0xddd   : > { %2906 = vmatpush3.bf16.msra.mxu0 %v3091_v10 }
 0xdde   : > { %2907 = vmatprep.subr.bf16.mxu0 %v3312_v50 }
 0xde1   : > { %2908 = vmatpush3.bf16.msra.mxu0 %v3092_v36 }
 0xde2   : > { %2909 = vmatprep.subr.bf16.mxu0 %v3312_v50 }
 0xde5   : > { %2910 = vmatpush3.bf16.msra.mxu0 %v3093_v15 }
 0xde6   :  { %2923 = vmatprep.subr.bf16.mxu0 (%p180_p0), %v3311_v12 }
 0xe6f   : > { %v2062_v43 = vpop.f32.mrf.mxu1 }
 0xe70   : > { %v2063_v49 = vadd.f32 %v2062_v43, %v1997_v39 }
 0xe71   : > { %v2885_v19 = vpop.f32.mrf.mxu1 }
 0xe72   : > { %v2091_v7 = vmul.f32 0.70710677, %v2063_v49  ;;  %v2085_v45 = vmul.f32 0.5, %v2063_v49 }
 0xe73   : > { %v2065_v44 = vpop.f32.mrf.mxu1 }
 0xe74   : > { %3202 = verf.f32 %v2091_v7  ;;  %v2066_v54 = vadd.f32 %v2065_v44, %v1997_v39 }
 0xe75   : > { %v2886_v38 = vpop.f32.mrf.mxu1 }
 0xe76   : > { %v2092_v32 = vmul.f32 0.70710677, %v2066_v54  ;;  %v2086_v52 = vmul.f32 0.5, %v2066_v54  ;;  %v2121_v38 = vsub.s32 5, %v3403_v14 }
 0xe78   : > { %3204 = verf.f32 %v2092_v32  ;;  %v2122_v32 = vrot.slane %v3898_v63, %v2121_v38 }
 0xe81   : > { %v3203_v2 = vpop.eup %3202 }
 0xe82   : > { %v2103_v3 = vadd.f32 1.0, %v3203_v2 }
 0xe84   : > { %v2109_v53 = vmul.f32 %v2103_v3, %v2085_v45 }
 0xe85   : > { %v3205_v59 = vpop.eup %3204 }
 0xe86   : > { %v2104_v34 = vadd.f32 1.0, %v3205_v59 }
 0xe88   : > { %v2110_v8 = vmul.f32 %v2104_v34, %v2086_v52 }
 0xe8a   : > { %v2115_v6 = vpack.c.bf16 %v2110_v8, %v2109_v53 }
 0xe8c   : > { %2912 = vmatmul.mubr.bf16.vlgmr.msra.gmra.mxu0 %v2115_v6 }
 0xe8d   : > { %v2070_v46 = vpop.f32.mrf.mxu1  ;;  %2915 = vmatprep.mubr.msk.bf16.mxu0 %vm3313_vm4, %v3312_v50  ;;  %2924 = vmatpush3.bf16.msra.mxu0 (%p180_p0), %v3229_v13 }
 0xe8e   : > { %v2071_v25 = vadd.f32 %v2070_v46, %v1997_v39  ;;  %2925 = vmatprep.subr.bf16.mxu0 (%p180_p0), %v3311_v12 }
 0xe8f   : > { %v2889_v9 = vpop.f32.mrf.mxu1 }
 0xe90   : > { %v2093_v11 = vmul.f32 0.70710677, %v2071_v25  ;;  %v2087_v47 = vmul.f32 0.5, %v2071_v25 }
 0xe91   : > { %v2073_v37 = vpop.f32.mrf.mxu1  ;;  %2926 = vmatpush3.bf16.msra.mxu0 (%p180_p0), %v3230_v17 }
 0xe92   : > { %3206 = verf.f32 %v2093_v11  ;;  %v2074_v16 = vadd.f32 %v2073_v37, %v1997_v39 }
 0xe93   : > { %v2890_v5 = vpop.f32.mrf.mxu1 }
 0xe94   : > { %v2094_v60 = vmul.f32 0.70710677, %v2074_v16  ;;  %v2088_v33 = vmul.f32 0.5, %v2074_v16 }
 0xe96   : > { %3208 = verf.f32 %v2094_v60 }
 0xe9a   : > { %v2078_v58 = vpop.f32.mrf.mxu1 }
 0xe9b   : > { %v2079_v55 = vadd.f32 %v2078_v58, %v1997_v39 }
 0xe9c   : > { %v2893_v40 = vpop.f32.mrf.mxu1 }
 0xe9d   : > { %v2095_v61 = vmul.f32 0.70710677, %v2079_v55  ;;  %v2089_v26 = vmul.f32 0.5, %v2079_v55 }
 0xe9e   : > { %v2081_v22 = vpop.f32.mrf.mxu1 }
 0xe9f   : > { %v3207_v62 = vpop.eup %3206  ;;  %3210 = verf.f32 %v2095_v61  ;;  %v2082_v41 = vadd.f32 %v2081_v22, %v1997_v39 }
 0xea0   : > { %v2894_v0 = vpop.f32.mrf.mxu1  ;;  %v2105_v51 = vadd.f32 1.0, %v3207_v62 }
 0xea1   : > { %v2096_v1 = vmul.f32 0.70710677, %v2082_v41  ;;  %v2090_v15 = vmul.f32 0.5, %v2082_v41 }
 0xea2   : > { %v2111_v35 = vmul.f32 %v2105_v51, %v2087_v47 }
 0xea3   : > { %v3209_v31 = vpop.eup %3208  ;;  %3212 = verf.f32 %v2096_v1 }
 0xea4   : > { %v2106_v20 = vadd.f32 1.0, %v3209_v31 }
 0xea6   : > { %v2112_v27 = vmul.f32 %v2106_v20, %v2088_v33 }
 0xea8   : > { %v2607_v48 = vpack.c.bf16 %v2112_v27, %v2111_v35 }
 0xeaa   : > { %2916 = vmatmul.mubr.bf16.gmra.mxu0 %v2607_v48 }
 0xeab   : > { %2919 = vmatprep.mubr.msk.bf16.mxu0 %vm3313_vm4, %v3312_v50 }
 0xeac   : > { %v3211_v23 = vpop.eup %3210 }
 0xead   : > { %v2107_v4 = vadd.f32 1.0, %v3211_v23 }
 0xeaf   : > { %v2113_v10 = vmul.f32 %v2107_v4, %v2089_v26 }
 0xeb0   : > { %v3213_v36 = vpop.eup %3212 }
 0xeb1   : > { %v2108_v39 = vadd.f32 1.0, %v3213_v36  ;;  %v2117_v49 = vpack.c.bf16 %v2113_v10, %v2112_v27 }
 0xeb3   : > { %v2114_v43 = vmul.f32 %v2108_v39, %v2090_v15  ;;  %v2131_v44 = vunpack.c.h.b16 %v2117_v49 }
 0xeb5   : > { %v2118_v19 = vpack.c.bf16 %v2114_v43, %v2114_v43 }
 0xeb7   : > { %v2132_v7 = vunpack.c.l.b16 %v2118_v19 }
 0xeb9   : > { %v2135_v54 = vpack.c.b16 %v2132_v7, %v2131_v44 }
 0xebb   : > { %2920 = vmatmul.mubr.bf16.gmra.mxu0 %v2135_v54 }
 0xebc   :  { %2927 = vmatprep.mubr.msk.bf16.mxu0 (%p180_p0), %vm3329_vm12, %v3311_v12 }
 0xf4c   : > { %v2221_v2 = vpop.f32.mrf.mxu0 }
 0xf4d   : > { %v2222_v50 = vadd.f32 %v2221_v2, %v2122_v32  ;;  %v2342_v2 = vsub.s32 6, %v3403_v14 }
 0xf4e   : > { %v2913_v3 = vpop.f32.mrf.mxu0 }
 0xf4f   : > { %v4031_v59 = vadd.f32 %v2222_v50, %v3967_v57  ;;  %v2352_v50 = vsub.s32 7, %v3403_v14  ;;  %v2343_v3 = vrot.slane %v3898_v63, %v2342_v2  ;;  %v2598_v14 = vld [vmem:[%s4142_s7] ss:$0 sm:$0xff] (%p180_p0) }
 0xf50   : > { %v2224_v45 = vpop.f32.mrf.mxu0 }
 0xf51   : > { %v2225_v52 = vadd.f32 %v2224_v45, %v2122_v32  ;;  %v2250_v34 = vsel %vm251_vm5, %v4031_v59, 0.0  ;;  %v2274_v53 = vmul.f32 %v4031_v59, %v4031_v59 }
 0xf52   : > { %2251 = vadd.xlane.f32.xlu0 %v2250_v34  ;;  %v2914_v8 = vpop.f32.mrf.mxu0  ;;  %v2353_v34 = vrot.slane %v3898_v63, %v2352_v50 }
 0xf53   : > { %v4038_v6 = vadd.f32 %v2225_v52, %v3970_v30  ;;  %v2280_v46 = vsel %vm251_vm5, %v2274_v53, 0.0 }
 0xf55   : > { %v2253_v25 = vsel %vm251_vm5, %v4038_v6, 0.0  ;;  %v2275_v57 = vmul.f32 %v4038_v6, %v4038_v6 }
 0xf56   : > { %2281 = vadd.xlane.f32.xlu0 %v2280_v46  ;;  %2254 = vadd.xlane.f32.xlu1 %v2253_v25 }
 0xf57   : > { %v2283_v9 = vsel %vm251_vm5, %v2275_v57, 0.0 }
 0xf5a   : > { %2284 = vadd.xlane.f32.xlu1 %v2283_v9 }
 0xf6a   : > { %v2229_v11 = vpop.f32.mrf.mxu0 }
 0xf6b   : > { %v2230_v37 = vadd.f32 %v2229_v11, %v2122_v32 }
 0xf6c   : > { %v2917_v16 = vpop.f32.mrf.mxu0 }
 0xf6d   : > { %v4047_v5 = vadd.f32 %v2230_v37, %v3983_v21 }
 0xf6e   : > { %v2232_v30 = vpop.f32.mrf.mxu0 }
 0xf6f   : > { %v2233_v60 = vadd.f32 %v2232_v30, %v2122_v32  ;;  %v2256_v58 = vsel %vm251_vm5, %v4047_v5, 0.0  ;;  %v2276_v55 = vmul.f32 %v4047_v5, %v4047_v5 }
 0xf70   : > { %2257 = vadd.xlane.f32.xlu0 %v2256_v58  ;;  %v2918_v40 = vpop.f32.mrf.mxu0 }
 0xf71   : > { %v4054_v61 = vadd.f32 %v2233_v60, %v3986_v24  ;;  %v2286_v22 = vsel %vm251_vm5, %v2276_v55, 0.0 }
 0xf73   : > { %v2259_v62 = vsel %vm251_vm5, %v4054_v61, 0.0  ;;  %v2277_v21 = vmul.f32 %v4054_v61, %v4054_v61 }
 0xf74   : > { %2287 = vadd.xlane.f32.xlu0 %v2286_v22  ;;  %2260 = vadd.xlane.f32.xlu1 %v2259_v62 }
 0xf75   : > { %v2289_v41 = vsel %vm251_vm5, %v2277_v21, 0.0 }
 0xf78   : > { %2290 = vadd.xlane.f32.xlu1 %v2289_v41 }
 0xf7b   : > { %v2237_v0 = vpop.f32.mrf.mxu0 }
 0xf7c   : > { %v2238_v1 = vadd.f32 %v2237_v0, %v2122_v32 }
 0xf7d   : > { %v2921_v51 = vpop.f32.mrf.mxu0 }
 0xf7e   : > { %v4063_v31 = vadd.f32 %v2238_v1, %v3996_v28 }
 0xf7f   : > { %v2240_v24 = vpop.f32.mrf.mxu0 }
 0xf80   : > { %v2241_v47 = vadd.f32 %v2240_v24, %v2122_v32  ;;  %v2262_v33 = vsel %vm251_vm5, %v4063_v31, 0.0  ;;  %v2278_v20 = vmul.f32 %v4063_v31, %v4063_v31 }
 0xf81   : > { %2263 = vadd.xlane.f32.xlu0 %v2262_v33  ;;  %v2922_v35 = vpop.f32.mrf.mxu0 }
 0xf82   : > { %v4070_v27 = vadd.f32 %v2241_v47, %v4000_v42  ;;  %v2292_v48 = vsel %vm251_vm5, %v2278_v20, 0.0 }
 0xf84   : > { %v2265_v23 = vsel %vm251_vm5, %v4070_v27, 0.0  ;;  %v2279_v28 = vmul.f32 %v4070_v27, %v4070_v27 }
 0xf85   : > { %2293 = vadd.xlane.f32.xlu0 %v2292_v48  ;;  %2266 = vadd.xlane.f32.xlu1 %v2265_v23 }
 0xf86   : > { %v2295_v26 = vsel %vm251_vm5, %v2279_v28, 0.0 }
 0xf89   : > { %2296 = vadd.xlane.f32.xlu1 %v2295_v26 }
 0xfdb   : > { %v2252_v4 = vpop.xlane.xlu0 %2251 }
 0xfdc   : > { %v2268_v10 = vmul.f32 0.03125, %v2252_v4 }
 0xfde   : > { %v2304_v39 = vmul.f32 %v2268_v10, %v2268_v10  ;;  %v2316_v45 = vsub.f32 %v4031_v59, %v2268_v10 }
 0xfdf   : > { %v2282_v36 = vpop.xlane.xlu0 %2281  ;;  %v2255_v15 = vpop.xlane.xlu1 %2254 }
 0xfe0   : > { %v2298_v42 = vmul.f32 0.03125, %v2282_v36  ;;  %v2269_v43 = vmul.f32 0.03125, %v2255_v15 }
 0xfe2   : > { %v2310_v49 = vsub.f32 %v2298_v42, %v2304_v39  ;;  %v2305_v44 = vmul.f32 %v2269_v43, %v2269_v43  ;;  %v2317_v46 = vsub.f32 %v4038_v6, %v2269_v43 }
 0xfe3   : > { %v2285_v19 = vpop.xlane.xlu1 %2284 }
 0xfe4   : > { %v2322_v7 = vadd.f32 1e-05, %v2310_v49  ;;  %v2299_v54 = vmul.f32 0.03125, %v2285_v19 }
 0xfe6   : > { %3214 = vrsqrt.f32 %v2322_v7  ;;  %v2311_v38 = vsub.f32 %v2299_v54, %v2305_v44 }
 0xfe8   : > { %v2323_v32 = vadd.f32 1e-05, %v2311_v38 }
 0xfea   : > { %3216 = vrsqrt.f32 %v2323_v32 }
 0xff3   : > { %v3215_v52 = vpop.eup %3214 }
 0xff4   : > { %v2334_v53 = vmul.f32 %v3215_v52, %v2316_v45 }
 0xff6   : > { %v2344_v8 = vmul.f32 %v2343_v3, %v2334_v53 }
 0xff7   : > { %v3217_v25 = vpop.eup %3216 }
 0xff8   : > { %v4084_v42 = vadd.f32 %v2353_v34, %v2344_v8   ;;  %v2335_v9 = vmul.f32 %v3217_v25, %v2317_v46 }
 0xff9   : > { %v2258_v11 = vpop.xlane.xlu0 %2257 }
 0xffa   : > { %v4144_v57 = vmov %v4084_v42  ;;  %v2345_v37 = vmul.f32 %v2343_v3, %v2335_v9  ;;  %v2270_v16 = vmul.f32 0.03125, %v2258_v11 }
 0xffc   : > { %v2355_v48 = vadd.f32 %v2353_v34, %v2345_v37   ;;  %v2306_v58 = vmul.f32 %v2270_v16, %v2270_v16  ;;  %v2318_v35 = vsub.f32 %v4047_v5, %v2270_v16 }
 0xffd   : > { %v2288_v30 = vpop.xlane.xlu0 %2287  ;;  %v2261_v60 = vpop.xlane.xlu1 %2260 }
 0xffe   : > { %v2300_v55 = vmul.f32 0.03125, %v2288_v30  ;;  %v2271_v59 = vmul.f32 0.03125, %v2261_v60 }
0x1000   : > { %v2312_v40 = vsub.f32 %v2300_v55, %v2306_v58  ;;  %v2307_v62 = vmul.f32 %v2271_v59, %v2271_v59  ;;  %v2319_v42 = vsub.f32 %v4054_v61, %v2271_v59 }
0x1001   : > { %v2291_v22 = vpop.xlane.xlu1 %2290 }
0x1002   : > { %v2324_v63 = vadd.f32 1e-05, %v2312_v40  ;;  %v2301_v21 = vmul.f32 0.03125, %v2291_v22  ;;  %v2402_v22 = vrot.slane (%p180_p0), %v3415_v18, %v1982_v56 }
0x1004   : > { %3218 = vrsqrt.f32 %v2324_v63  ;;  %v2313_v6 = vsub.f32 %v2301_v21, %v2307_v62 }
0x1006   : > { %v2325_v41 = vadd.f32 1e-05, %v2313_v6  ;;  %v2408_v6 = vrot.slane (%p180_p0), %v3415_v18, %v1996_v29 }
0x1008   : > { %3220 = vrsqrt.f32 %v2325_v41 }
0x100a   : > { %v2264_v0 = vpop.xlane.xlu0 %2263 }
0x100b   : > { %v2272_v1 = vmul.f32 0.03125, %v2264_v0 }
0x100d   : > { %v2308_v47 = vmul.f32 %v2272_v1, %v2272_v1  ;;  %v2320_v5 = vsub.f32 %v4063_v31, %v2272_v1 }
0x100e   : > { %v2294_v51 = vpop.xlane.xlu0 %2293  ;;  %v2267_v24 = vpop.xlane.xlu1 %2266 }
0x100f   : > { %v2302_v33 = vmul.f32 0.03125, %v2294_v51  ;;  %v2273_v20 = vmul.f32 0.03125, %v2267_v24 }
0x1011   : > { %v3219_v23 = vpop.eup %3218  ;;  %v2314_v28 = vsub.f32 %v2302_v33, %v2308_v47  ;;  %v2309_v36 = vmul.f32 %v2273_v20, %v2273_v20  ;;  %v2321_v45 = vsub.f32 %v4070_v27, %v2273_v20  ;;  %v2372_v27 = vmul.f32 (%p180_p0), %v4144_v57, %v4144_v57 }
0x1012   : > { %v2336_v26 = vmul.f32 %v3219_v23, %v2318_v35  ;;  %v2297_v4 = vpop.xlane.xlu1 %2296 }
0x1013   : > { %v2326_v10 = vadd.f32 1e-05, %v2314_v28  ;;  %v2303_v15 = vmul.f32 0.03125, %v2297_v4 }
0x1014   : > { %v2346_v39 = vmul.f32 %v2343_v3, %v2336_v26 }
0x1015   : > { %v3221_v43 = vpop.eup %3220  ;;  %3222 = vrsqrt.f32 %v2326_v10  ;;  %v2315_v49 = vsub.f32 %v2303_v15, %v2309_v36 }
0x1016   : > { %v2356_v19 = vadd.f32 %v2353_v34, %v2346_v39   ;;  %v2337_v7 = vmul.f32 %v3221_v43, %v2319_v42  ;;  %v4148_v42 = vmov %v4144_v57 }
0x1017   : > { %v2327_v44 = vadd.f32 1e-05, %v2315_v49 }
0x1018   : > { %v2347_v54 = vmul.f32 %v2343_v3, %v2337_v7  ;;  %v4147_v49 = vmov %v2356_v19 }
0x1019   : > { %3224 = vrsqrt.f32 %v2327_v44 }
0x101a   : > { %v2357_v32 = vadd.f32 %v2353_v34, %v2347_v54  }
0x101c   :  { %v2362_v31 = vrot.slane (%p180_p0), %v2357_v32, 7 }
0x1022   : > { %v3223_v38 = vpop.eup %3222 }
0x1023   : > { %v2338_v2 = vmul.f32 %v3223_v38, %v2320_v5  ;;  %v4146_v38 = vmov %v2357_v32 }
0x1025   : > { %v2348_v50 = vmul.f32 %v2343_v3, %v2338_v2 }
0x1026   : > { %v3225_v52 = vpop.eup %3224 }
0x1027   : > { %v2358_v53 = vadd.f32 %v2353_v34, %v2348_v50   ;;  %v2339_v8 = vmul.f32 %v3225_v52, %v2321_v45  ;;  %182 = sbr.rel (!%p180_p0) target bundleno = 224 (0xe0), region = 62 }
0x1029   : > { %v2349_v61 = vmul.f32 %v2343_v3, %v2339_v8  ;;  %v4145_v45 = vmov %v2358_v53  ;;  %v2373_v3 = vmul.f32 (%p180_p0), %v2357_v32, %v2357_v32 }
0x102b   : > { %v2359_v46 = vadd.f32 %v2353_v34, %v2349_v61   ;;  %v2364_v34 = vsel (%p180_p0), %vm2363_vm10, %v2362_v31, %v4144_v57  ;;  %v2376_v9 = vrot.slane (%p180_p0), %v2373_v3, 7 }
0x102c   :  { %v2367_v25 = vsel %vm2366_vm11, %v2364_v34, 0.0 }
0x102d   :  { %2368 = vadd.xlane.f32.xlu0 %v2367_v25  ;;  %v2377_v11 = vsel %vm2363_vm10, %v2376_v9, %v2372_v27 }
0x102e   :  { %v2379_v37 = vsel %vm2366_vm11, %v2377_v11, 0.0 }
0x1031   :  { %2380 = vadd.xlane.f32.xlu0 %v2379_v37 }
0x10b6   :  { %v2369_v48 = vpop.xlane.xlu0 %2368 }
0x10b7   :  { %v2371_v46 = vmul.f32 0.03125, %v2369_v48 }
0x10b9   :  { %v2383_v30 = vmul.f32 %v2371_v46, %v2371_v46  ;;  %v2386_v59 = vrot.slane %v2371_v46, 1  ;;  %v2389_v40 = vsub.f32 %v4144_v57, %v2371_v46 }
0x10ba   :  { %v2381_v16 = vpop.xlane.xlu0 %2380 }
0x10bb   :  { %v2382_v60 = vmul.f32 0.03125, %v2381_v16  ;;  %v2390_v62 = vsub.f32 %v2357_v32, %v2386_v59 }
0x10bd   :  { %v2384_v58 = vsub.f32 %v2382_v60, %v2383_v30 }
0x10bf   :  { %v2391_v55 = vadd.f32 1e-05, %v2384_v58 }
0x10c1   :  { %3231 = vrsqrt.f32 %v2391_v55 }
0x10ce   :  { %v3232_v63 = vpop.eup %3231 }
0x10cf   :  { %v2394_v21 = vrot.slane %v3232_v63, 1  ;;  %v2397_v12 = vmul.f32 %v3232_v63, %v2389_v40 }
0x10d1   :  { %v2398_v41 = vmul.f32 %v2394_v21, %v2390_v62  ;;  %v2403_v0 = vmul.f32 %v2402_v22, %v2397_v12 }
0x10d3   :  { %v2404_v1 = vmul.f32 %v2402_v22, %v2398_v41  ;;  %v2409_v51 = vadd.f32 %v2408_v6, %v2403_v0 }
0x10d5   :  { %v2410_v24 = vadd.f32 %v2408_v6, %v2404_v1  ;;  %v2411_v47 = vpack.c.bf16 %v2409_v51, %v2409_v51 }
0x10d7   :  { %v2412_v33 = vpack.c.bf16 %v2410_v24, %v2410_v24  ;;  %v2426_v20 = vunpack.c.l.b16 %v2411_v47 }
0x10d9   :  { %v2427_v57 = vunpack.c.l.b16 %v2412_v33 }
0x10db   :  { %v2428_v35 = vrot.slane %v2427_v57, 7 }
0x10dd   :  { %v2429_v56 = vsel %vm2363_vm10, %v2428_v35, %v2426_v20 }
0x10de   :  { %v2430_v23 = vpack.c.b16 %v2429_v56, %v2429_v56 }
0x10e0   :  { %2928 = vmatmul.mubr.msk.bf16.vlgmr.msra.gmra.mxu0 %vm251_vm5, %v2430_v23 }
0x11a0   :  { %v2481_v18 = vpop.f32.mrf.mxu0 }
0x11a1   :  { %v2482_v29 = vadd.f32 %v2598_v14, %v2481_v18 }
0x11a2   :  { %v2929_v28 = vpop.f32.mrf.mxu0 }
0x11a3   :  { %2487 = vst [vmem:[#allocation2] sm:$0x3] %v2482_v29 }
0x11a4   :  { %v2484_v26 = vpop.f32.mrf.mxu0 }
0x11a5   :  { %3244 = shalt.err (!%p3241_p5)
}
0x11a6   :  { %2497 = dma.vmem_to_hbm [thread:$0]  %s2495_s30, 32, %s4143_s8, [#allocation3]   ;;  %v2930_v4 = vpop.f32.mrf.mxu0 }
0x11a7   :  { %3281 = dma.done.wait [#allocation3], 32  }
0x11a8   :  { %3282 = vsyncadd [#allocation3], 4294967264 }
0x11a9   :  { %2501 = vsyncpa [#allocation3], 1 }

</bundles_post_ra>
